<compile_context>
chip_gen: v7x
topology: tpu7x:2x2x1
jax: 0.10.0
libtpu: 0.0.40
codegen_flags: <defaults>
</compile_context>

<pallas_src>
import numpy as np
import jax
import jax.numpy as jnp
from jax.experimental import pallas as pl
from jax.experimental.pallas import tpu as pltpu


# ------------------------------- Pallas kernel --------------------------------

def _eca_kernel(x_ref, wf_ref, w2_ref, b2_ref, out_ref):
    """Fused Enhanced_Channel_Attenion forward for one batch tile.

    x_ref:  (TB, C*L)  activations, native dtype, lane-dense
    wf_ref: (C*L, H)   folded avgpool -> down_op -> fc_1 weight (x.dtype)
    w2_ref: (H, C)     fc_2 weight, transposed (f32)
    b2_ref: (1, C)     fc_2 bias (f32)
    out_ref:(TB, C)    1 + sigmoid(...)   (reshaped to (B, C, 1) outside)
    """
    # avg-pool + down_op + fc_1 all folded into one MXU matmul, then ReLU.
    z = jnp.maximum(
        jnp.dot(x_ref[...], wf_ref[...], preferred_element_type=jnp.float32),
        0.0)                                                            # (TB, H)
    # fc_2 (+ bias), sigmoid, ones + x.
    y = jnp.dot(z, w2_ref[...], preferred_element_type=jnp.float32) + b2_ref[...]
    out_ref[...] = (1.0 + jax.nn.sigmoid(y)).astype(out_ref.dtype)      # (TB, C)


# ------------------------------- host wrapper ---------------------------------

def _chip_config():
    """Return (batch-tile cap, vmem_limit_bytes) per TPU generation."""
    kind = ""
    try:
        kind = jax.devices()[0].device_kind.lower()
    except Exception:
        pass
    if "v5 lite" in kind or "v5e" in kind or "v5lite" in kind:
        return 128, 32 * 1024 * 1024        # v5e: small scoped-VMEM default
    if "v7" in kind:
        return 1024, 48 * 1024 * 1024       # v7x: only 64 MiB physical VMEM / TC
    return 1024, 64 * 1024 * 1024           # v6e / v4 / default: 128 MiB physical


def _pick_batch_tile(Bp, row_bytes, tb_cap, vmem_limit):
    """Bp is a multiple of 8.  Keep the double-buffered x tiles within ~half of
    the VMEM budget, honor the per-chip cap, and guarantee >=2 grid steps when
    Bp >= 16 so the 'parallel' batch axis can shard across v7x's two TCs."""
    cap_from_vmem = max(8, ((vmem_limit // 2) // (2 * row_bytes)) // 8 * 8)
    tb = min(Bp, tb_cap, cap_from_vmem)
    if Bp >= 16:
        tb = min(tb, Bp // 2)
    tb = max(8, tb - tb % 8)
    while Bp % tb != 0:                      # tb=8 always divides Bp
        tb -= 8
    return tb


def enhanced_channel_attention_forward(x, w_down, w_fc1, w_fc2, b_fc2):
    """x: (B, C, L); w_down: (C, C, 2); w_fc1: (H, C); w_fc2: (C, H); b_fc2: (C,).

    Returns (B, C, 1) = 1 + sigmoid(fc_2(relu(fc_1(down_op(cat(avg, avg)))))).
    """
    x = jnp.asarray(x)                       # keep native dtype (no f32 upcast)
    B, C, L = x.shape
    H = w_fc1.shape[0]
    f32 = jnp.float32
    CL = C * L

    # ---- host-side weight folding (tiny, done once) ----
    wd = jnp.asarray(w_down, f32)                            # (C, C, 2)
    wd_t = (wd[:, :, 0] + wd[:, :, 1]).T                     # k=2 conv on [avg, avg]
    w1_t = jnp.asarray(w_fc1, f32).T                         # (C, H)
    m = wd_t @ w1_t                                          # (C, H)
    # avg-pool fold: mean over L == x2d @ P with P[c*L + l, c] = 1/L.
    wfold = (jnp.repeat(m, L, axis=0) * f32(1.0 / L)).astype(x.dtype)   # (C*L, H)
    w2_t = jnp.asarray(w_fc2, f32).T                         # (H, C)
    b2 = jnp.asarray(b_fc2, f32).reshape(1, C)

    # ---- lane-dense x view + batch padding to a multiple of 8 ----
    x2d = x.reshape(B, CL)                                   # metadata-only reshape
    Bp = ((B + 7) // 8) * 8
    if Bp != B:
        x2d = jnp.pad(x2d, ((0, Bp - B), (0, 0)))

    tb_cap, vmem_limit = _chip_config()
    tb = _pick_batch_tile(Bp, CL * x2d.dtype.itemsize, tb_cap, vmem_limit)
    grid = (Bp // tb,)

    out2d = pl.pallas_call(
        _eca_kernel,
        out_shape=jax.ShapeDtypeStruct((Bp, C), x.dtype),
        grid_spec=pltpu.PrefetchScalarGridSpec(
            num_scalar_prefetch=0,
            grid=grid,
            in_specs=[
                pl.BlockSpec((tb, CL), lambda i: (i, 0)),    # x, lane-dense stream
                pl.BlockSpec((CL, H), lambda i: (0, 0)),     # folded pool∘down∘fc_1
                pl.BlockSpec((H, C), lambda i: (0, 0)),      # fc_2^T
                pl.BlockSpec((1, C), lambda i: (0, 0)),      # fc_2 bias
            ],
            out_specs=pl.BlockSpec((tb, C), lambda i: (i, 0)),
        ),
        compiler_params=pltpu.CompilerParams(
            dimension_semantics=("parallel",),
            vmem_limit_bytes=vmem_limit),
    )(x2d, wfold, w2_t, b2)

    # Module returns shape (-1, out_planes, 1); drop pad rows, metadata reshape.
    return out2d[:B].reshape(B, C, 1)


# ------------------------------ numpy reference --------------------------------

def _reference_np(x, w_down, w_fc1, w_fc2, b_fc2):
    x = x.astype(np.float64)
    B, C, L = x.shape
    avg = x.mean(-1)                                   # avg_pool
    mx = x.mean(-1)                                    # "max_pool" is also avg pool
    u = np.stack([avg, mx], axis=2)                    # (B, C, 2)
    # Conv1d(C, C, k=2, bias=False): out[b, o] = sum_{i,k} W[o, i, k] * u[b, i, k]
    v = np.einsum('oik,bik->bo', w_down.astype(np.float64), u)
    z = np.maximum(v @ w_fc1.astype(np.float64).T, 0.0)
    y = z @ w_fc2.astype(np.float64).T + b_fc2.astype(np.float64)
    s = 1.0 / (1.0 + np.exp(-y))
    return (1.0 + s).reshape(B, C, 1)


# ------------------------------------ main --------------------------------------

if __name__ == "__main__":
    # Enhanced_Channel_Attenion(in_planes=C, out_planes=C, ratio=16): fc_1 consumes
    # the squeezed (B, out_planes) tensor, so in_planes == out_planes is required.
    B, C, L, ratio = 4, 64, 48, 16
    H = C // ratio
    keys = jax.random.split(jax.random.PRNGKey(0), 5)

    def rnd(k, shape, scale=0.2):
        return np.asarray(jax.random.normal(k, shape, jnp.float32)) * scale

    x = np.asarray(jax.random.normal(keys[0], (B, C, L), jnp.float32))
    w_down = rnd(keys[1], (C, C, 2))          # down_op.weight (no bias)
    w_fc1 = rnd(keys[2], (H, C))              # fc_1.weight    (no bias)
    w_fc2 = rnd(keys[3], (C, H))              # fc_2.weight
    b_fc2 = rnd(keys[4], (C,), 0.1)           # fc_2.bias

    out = enhanced_channel_attention_forward(
        jnp.asarray(x), jnp.asarray(w_down), jnp.asarray(w_fc1),
        jnp.asarray(w_fc2), jnp.asarray(b_fc2))
    out = jax.block_until_ready(out)

    ref = _reference_np(x, w_down, w_fc1, w_fc2, b_fc2)
    np.testing.assert_allclose(np.asarray(out), ref, rtol=1e-3, atol=1e-3)
    print("KERNEL_OK")
</pallas_src>

<mosaic_0001>
module attributes {stable_mosaic.version = 11 : i64} {
  func.func @_eca_kernel(%arg0: i32, %arg1: memref<8x3072xf32, #tpu.memory_space<vmem>>, %arg2: memref<3072x4xf32, #tpu.memory_space<vmem>>, %arg3: memref<4x64xf32, #tpu.memory_space<vmem>>, %arg4: memref<1x64xf32, #tpu.memory_space<vmem>>, %arg5: memref<8x64xf32, #tpu.memory_space<vmem>>) attributes {dimension_semantics = [#tpu.dimension_semantics<parallel>], iteration_bounds = array<i64: 1>, scalar_prefetch = 0 : i64, scratch_operands = 0 : i64, tpu.core_type = #tpu.core_type<tc>, window_params = [{transform_indices = @transform_0, window_bounds = array<i64: 8, 3072>}, {pipeline_mode = #tpu.pipeline_mode<synchronous>, transform_indices = @transform_1, window_bounds = array<i64: 3072, 4>}, {pipeline_mode = #tpu.pipeline_mode<synchronous>, transform_indices = @transform_2, window_bounds = array<i64: 4, 64>}, {pipeline_mode = #tpu.pipeline_mode<synchronous>, transform_indices = @transform_3, window_bounds = array<i64: 1, 64>}, {transform_indices = @transform_4, window_bounds = array<i64: 8, 64>}]} {
    %c0 = arith.constant 0 : index
    %c0_0 = arith.constant 0 : index
    %0 = vector.load %arg1[%c0, %c0_0] : memref<8x3072xf32, #tpu.memory_space<vmem>>, vector<8x3072xf32>
    %c0_1 = arith.constant 0 : index
    %c0_2 = arith.constant 0 : index
    %1 = vector.load %arg2[%c0_1, %c0_2] : memref<3072x4xf32, #tpu.memory_space<vmem>>, vector<3072x4xf32>
    %cst = arith.constant dense<0.000000e+00> : vector<8x4xf32>
    %2 = tpu.matmul %0, %1, %cst {dimension_numbers = #tpu.dot_dimension_numbers<[1], [0], [0], [1], [0, 0, 1, 1], [], []>} : vector<8x3072xf32>, vector<3072x4xf32>, vector<8x4xf32> -> vector<8x4xf32>
    %cst_3 = arith.constant 0.000000e+00 : f32
    %3 = vector.broadcast %cst_3 : f32 to vector<8x4xf32>
    %4 = arith.maximumf %2, %3 : vector<8x4xf32>
    %c0_4 = arith.constant 0 : index
    %c0_5 = arith.constant 0 : index
    %5 = vector.load %arg3[%c0_4, %c0_5] : memref<4x64xf32, #tpu.memory_space<vmem>>, vector<4x64xf32>
    %cst_6 = arith.constant dense<0.000000e+00> : vector<8x64xf32>
    %6 = tpu.matmul %4, %5, %cst_6 {dimension_numbers = #tpu.dot_dimension_numbers<[1], [0], [0], [1], [0, 0, 1, 1], [], []>} : vector<8x4xf32>, vector<4x64xf32>, vector<8x64xf32> -> vector<8x64xf32>
    %c0_7 = arith.constant 0 : index
    %c0_8 = arith.constant 0 : index
    %7 = vector.load %arg4[%c0_7, %c0_8] : memref<1x64xf32, #tpu.memory_space<vmem>>, vector<1x64xf32>
    %8 = vector.broadcast %7 : vector<1x64xf32> to vector<8x64xf32>
    %9 = arith.addf %6, %8 : vector<8x64xf32>
    %10 = arith.negf %9 : vector<8x64xf32>
    %11 = math.exp %10 : vector<8x64xf32>
    %cst_9 = arith.constant 1.000000e+00 : f32
    %12 = vector.broadcast %cst_9 : f32 to vector<8x64xf32>
    %13 = arith.addf %12, %11 : vector<8x64xf32>
    %14 = arith.divf %12, %13 : vector<8x64xf32>
    %cst_10 = arith.constant 1.000000e+00 : f32
    %15 = vector.broadcast %cst_10 : f32 to vector<8x64xf32>
    %16 = arith.addf %15, %14 : vector<8x64xf32>
    %c0_11 = arith.constant 0 : index
    %c0_12 = arith.constant 0 : index
    %17 = vector.load %arg5[%c0_11, %c0_12] : memref<8x64xf32, #tpu.memory_space<vmem>>, vector<8x64xf32>
    tpu.vector_store %arg5[%c0_11, %c0_12], %16 {strides = array<i32>} : memref<8x64xf32, #tpu.memory_space<vmem>>, vector<8x64xf32>,
    return
  }
  func.func @transform_0(%arg0: i32) -> (i32, i32) {
    %c0_i32 = arith.constant 0 : i32
    %c0_i32_0 = arith.constant 0 : i32
    return %arg0, %c0_i32 : i32, i32
  }
  func.func @transform_1(%arg0: i32) -> (i32, i32) {
    %c0_i32 = arith.constant 0 : i32
    %c0_i32_0 = arith.constant 0 : i32
    %c0_i32_1 = arith.constant 0 : i32
    return %c0_i32, %c0_i32_0 : i32, i32
  }
  func.func @transform_2(%arg0: i32) -> (i32, i32) {
    %c0_i32 = arith.constant 0 : i32
    %c0_i32_0 = arith.constant 0 : i32
    %c0_i32_1 = arith.constant 0 : i32
    return %c0_i32, %c0_i32_0 : i32, i32
  }
  func.func @transform_3(%arg0: i32) -> (i32, i32) {
    %c0_i32 = arith.constant 0 : i32
    %c0_i32_0 = arith.constant 0 : i32
    %c0_i32_1 = arith.constant 0 : i32
    return %c0_i32, %c0_i32_0 : i32, i32
  }
  func.func @transform_4(%arg0: i32) -> (i32, i32) {
    %c0_i32 = arith.constant 0 : i32
    %c0_i32_0 = arith.constant 0 : i32
    return %arg0, %c0_i32 : i32, i32
  }
}

</mosaic_0001>

<bundles_post_ra>
// kernel: tpu_custom_call.1
= control target key start
LH: loop header
LB: loop body
LE: loop exit
PB: predicated region body
PF: predicated region fallthrough
CT: control target
= control target key end

     0   :  { %9 = vsyncpa [#allocation3], 0  ;;  %s2468_s0 = inlined_call_operand.hbm [shape: f32[8,3072], index: 0, kind: input, shape index: {}]   ;;  %s2469_s1 = inlined_call_operand.hbm [shape: f32[3072,4], index: 1, kind: input, shape index: {}]   ;;  %s2470_s2 = inlined_call_operand.hbm [shape: f32[4,64], index: 2, kind: input, shape index: {}]   ;;  %s2471_s3 = inlined_call_operand.hbm [shape: f32[1,64], index: 3, kind: input, shape index: {}]   ;;  %s2472_s4 = inlined_call_operand.hbm [shape: f32[8,64], index: 4, kind: output, shape index: {}]  }
   0x1   :  { %10 = vsyncpa [#allocation6], 0 }
   0x2   :  { %11 = vsyncpa [#allocation9], 0 }
   0x3   :  { %12 = vsyncpa [#allocation4], 0  ;;  %s2374_s15 = smov [#allocation5]   ;;  %s2256_s19 = scalar_lea.hbm %s2469_s1, 49152 }
   0x4   :  { %s28_s16 = sshll.u32 %s2374_s15, 4  ;;  %p2257_p0 = scmp.ne.s32.totalorder %s2469_s1, %s2256_s19  ;;  %s29_s16 = int_to_ptr.vmem [resolvable:$true] %s28_s16 }
   0x5   :  { %p2260_p1 = scmp.lt.u32.totalorder %s2256_s19, %s2469_s1 }
   0x7   :  { %p2262_p2 = pnand %p2260_p1, %p2257_p0 }
   0x9   :  { %2265 = shalt.err (!%p2262_p2)
}
   0xa   :  { %s2266_s24 = scalar_lea.vmem %s29_s16, 49152  ;;  %p2271_p4 = scmp.lt.s32.totalorder %s29_s16, %s29_s16 }
   0xb   :  { %p2267_p3 = scmp.ne.s32.totalorder %s29_s16, %s2266_s24  ;;  %p2272_p5 = scmp.lt.s32.totalorder %s2266_s24, %s2266_s24 }
   0xd   :  { %p2273_p6 = por %p2272_p5, %p2271_p4 }
   0xf   :  { %p2274_p7 = pnand %p2273_p6, %p2267_p3 }
  0x11   :  { %2277 = shalt.err (!%p2274_p7)
}
  0x12   :  { %s2375_s25 = smov 128   ;;  %s2376_s26 = smov 8  }
  0x13   :  { %34 = dma.hbm_to_vmem [thread:$0]  %s2469_s1, 49152, %s29_s16, [#allocation6], %s2375_s25, %s2375_s25, %s2376_s26  }
  0x14   :  { %s2377_s29 = smov [#allocation2]   ;;  %s2378_s5 = smov [#allocation7]  }
  0x15   :  { %s19_s30 = sshll.u32 %s2377_s29, 4  ;;  %s41_s6 = sshll.u32 %s2378_s5, 4  ;;  %s20_s30 = int_to_ptr.vmem [resolvable:$true] %s19_s30  ;;  %s42_s6 = int_to_ptr.vmem [resolvable:$true] %s41_s6 }
  0x16   :  { %s2278_s9 = scalar_lea.hbm %s2468_s0, 3072 }
  0x17   :  { %p2279_p8 = scmp.ne.s32.totalorder %s2468_s0, %s2278_s9  ;;  %p2282_p9 = scmp.lt.u32.totalorder %s2278_s9, %s2468_s0 }
  0x19   :  { %p2284_p10 = pnand %p2282_p9, %p2279_p8 }
  0x1b   :  { %2287 = shalt.err (!%p2284_p10)
}
  0x1c   :  { %s2288_s1 = scalar_lea.vmem %s20_s30, 3072  ;;  %p2293_p12 = scmp.lt.s32.totalorder %s20_s30, %s20_s30 }
  0x1d   :  { %p2289_p11 = scmp.ne.s32.totalorder %s20_s30, %s2288_s1  ;;  %p2294_p13 = scmp.lt.s32.totalorder %s2288_s1, %s2288_s1 }
  0x1f   :  { %p2295_p0 = por %p2294_p13, %p2293_p12 }
  0x21   :  { %p2296_p1 = pnand %p2295_p0, %p2289_p11 }
  0x23   :  { %2299 = shalt.err (!%p2296_p1)
}
  0x24   :  { %22 = dma.hbm_to_vmem [thread:$0]  %s2468_s0, 3072, %s20_s30, [#allocation3]  }
  0x25   :  { %s2300_s18 = scalar_lea.hbm %s2470_s2, 64 }
  0x26   :  { %p2301_p2 = scmp.ne.s32.totalorder %s2470_s2, %s2300_s18  ;;  %p2304_p3 = scmp.lt.u32.totalorder %s2300_s18, %s2470_s2 }
  0x28   :  { %p2306_p4 = pnand %p2304_p3, %p2301_p2 }
  0x2a   :  { %2309 = shalt.err (!%p2306_p4)
}
  0x2b   :  { %s2310_s23 = scalar_lea.vmem %s42_s6, 64  ;;  %p2315_p6 = scmp.lt.s32.totalorder %s42_s6, %s42_s6 }
  0x2c   :  { %p2311_p5 = scmp.ne.s32.totalorder %s42_s6, %s2310_s23  ;;  %p2316_p7 = scmp.lt.s32.totalorder %s2310_s23, %s2310_s23 }
  0x2e   :  { %p2317_p8 = por %p2316_p7, %p2315_p6 }
  0x30   :  { %p2318_p9 = pnand %p2317_p8, %p2311_p5 }
  0x32   :  { %2321 = shalt.err (!%p2318_p9)
}
  0x33   :  { %44 = dma.hbm_to_vmem [thread:$0]  %s2470_s2, 64, %s42_s6, [#allocation6]  }
  0x34   :  { %s2379_s25 = smov [#allocation8]   ;;  %s2322_s29 = scalar_lea.hbm %s2471_s3, 16 }
  0x35   :  { %s51_s26 = sshll.u32 %s2379_s25, 4  ;;  %p2323_p10 = scmp.ne.s32.totalorder %s2471_s3, %s2322_s29  ;;  %s52_s26 = int_to_ptr.vmem [resolvable:$true] %s51_s26 }
  0x36   :  { %p2326_p11 = scmp.lt.u32.totalorder %s2322_s29, %s2471_s3 }
  0x38   :  { %p2328_p12 = pnand %p2326_p11, %p2323_p10 }
  0x3a   :  { %2331 = shalt.err (!%p2328_p12)
}
  0x3b   :  { %s2332_s9 = scalar_lea.vmem %s52_s26, 16  ;;  %s2336_s2 = scalar_lea.vmem %s52_s26, 32 }
  0x3c   :  { %p2333_p13 = scmp.ne.s32.totalorder %s52_s26, %s2332_s9  ;;  %p2337_p0 = scmp.lt.s32.totalorder %s52_s26, %s52_s26 }
  0x3d   :  { %p2338_p1 = scmp.lt.s32.totalorder %s2336_s2, %s2332_s9 }
  0x3f   :  { %p2339_p2 = por %p2338_p1, %p2337_p0 }
  0x41   :  { %p2340_p3 = pnand %p2339_p2, %p2333_p13 }
  0x43   :  { %2343 = shalt.err (!%p2340_p3)
}
  0x44   :  { %54 = dma.hbm_to_vmem [thread:$0]  %s2471_s3, 16, %s52_s26, [#allocation9]  }
  0x45   :  { %2366 = dma.done.wait [#allocation3], 3072  }
  0x46   :  { %2367 = vsyncadd [#allocation3], 4294964224 }
  0x47   :  { %2368 = dma.done.wait [#allocation6], 49216  }
  0x48   :  { %2369 = vsyncadd [#allocation6], 4294918080 }
  0x49   :  { %2370 = dma.done.wait [#allocation9], 16  }
  0x4a   :  { %2371 = vsyncadd [#allocation9], 4294967280  ;;  %v107_v0 = vld [vmem:[#allocation5 + $0x80] sm:$0xff]  ;;  %v108_v1 = vld [vmem:[#allocation5 + $0x88] sm:$0xff]  ;;  %vm1328_vm0 = vcmask 1043456   ;;  %vm2381_vm1 = vmmov 0  }
  0x4b   :  { %v139_v2 = vld [vmem:[#allocation5 + $0x180] sm:$0xff]  ;;  %v1859_v3 = vpack.c.bf16 %v108_v1, %v107_v0  ;;  %v140_v4 = vld [vmem:[#allocation5 + $0x188] sm:$0xff]  ;;  %v109_v11 = vld [vmem:[#allocation5 + $0x90] sm:$0xff]  ;;  %vm1324_vm2 = vcmask 31744   ;;  %s2382_s3 = smov [#allocation10]   ;;  %vm1409_vm3 = vcmask 523264  }
  0x4c   :  { %v91_v5 = vld [vmem:[#allocation5] sm:$0xff]  ;;  %v92_v6 = vld [vmem:[#allocation5 + $0x8] sm:$0xff]  ;;  %v1891_v7 = vpack.c.bf16 %v140_v4, %v139_v2  ;;  %v110_v13 = vld [vmem:[#allocation5 + $0x98] sm:$0xff]  ;;  %s1417_s11 = sshll.u32 %s2382_s3, 4  ;;  %s1418_s11 = int_to_ptr.vmem [resolvable:$true] %s1417_s11 }
  0x4d   :  { %v1861_v8 = vpack.c.bf16 %v92_v6, %v91_v5  ;;  %v123_v9 = vld [vmem:[#allocation5 + $0x100] sm:$0xff]  ;;  %v124_v10 = vld [vmem:[#allocation5 + $0x108] sm:$0xff]  ;;  %1860 = vmatprep.subr.bf16.mxu0 %v1859_v3  ;;  %v141_v14 = vld [vmem:[#allocation5 + $0x190] sm:$0xff]  ;;  %v1863_v16 = vpack.c.bf16 %v110_v13, %v109_v11  ;;  %s2344_s12 = scalar_lea.vmem %s1418_s11, 128  ;;  %p2349_p5 = scmp.lt.s32.totalorder %s1418_s11, %s1418_s11 }
  0x4e   :  { %v1893_v12 = vpack.c.bf16 %v124_v10, %v123_v9  ;;  %v142_v15 = vld [vmem:[#allocation5 + $0x198] sm:$0xff]  ;;  %1892 = vmatprep.subr.bf16.mxu1 %v1891_v7  ;;  %v93_v18 = vld [vmem:[#allocation5 + $0x10] sm:$0xff]  ;;  %v111_v23 = vld [vmem:[#allocation5 + $0xa0] sm:$0xff]  ;;  %p2345_p4 = scmp.ne.s32.totalorder %s1418_s11, %s2344_s12  ;;  %p2350_p6 = scmp.lt.s32.totalorder %s2344_s12, %s2344_s12 }
  0x4f   :  { %1862 = vmatpush3.bf16.msra.mxu0 %v1861_v8  ;;  %v1895_v17 = vpack.c.bf16 %v142_v15, %v141_v14  ;;  %v94_v19 = vld [vmem:[#allocation5 + $0x18] sm:$0xff]  ;;  %v125_v20 = vld [vmem:[#allocation5 + $0x110] sm:$0xff]  ;;  %v112_v24 = vld [vmem:[#allocation5 + $0xa8] sm:$0xff] }
  0x50   :  { %1894 = vmatpush3.bf16.msra.mxu1 %v1893_v12  ;;  %v1865_v21 = vpack.c.bf16 %v94_v19, %v93_v18  ;;  %v126_v22 = vld [vmem:[#allocation5 + $0x118] sm:$0xff]  ;;  %1864 = vmatprep.subr.bf16.mxu0 %v1863_v16  ;;  %v1867_v26 = vpack.c.bf16 %v112_v24, %v111_v23  ;;  %v143_v27 = vld [vmem:[#allocation5 + $0x1a0] sm:$0xff]  ;;  %v144_v28 = vld [vmem:[#allocation5 + $0x1a8] sm:$0xff]  ;;  %p2351_p7 = por %p2350_p6, %p2349_p5 }
  0x51   :  { %1896 = vmatprep.subr.bf16.mxu1 %v1895_v17  ;;  %v1897_v25 = vpack.c.bf16 %v126_v22, %v125_v20  ;;  %v95_v29 = vld [vmem:[#allocation5 + $0x20] sm:$0xff]  ;;  %v1899_v30 = vpack.c.bf16 %v144_v28, %v143_v27  ;;  %v96_v31 = vld [vmem:[#allocation5 + $0x28] sm:$0xff]  ;;  %v113_v35 = vld [vmem:[#allocation5 + $0xb0] sm:$0xff] }
  0x52   :  { %v127_v32 = vld [vmem:[#allocation5 + $0x120] sm:$0xff]  ;;  %v128_v33 = vld [vmem:[#allocation5 + $0x128] sm:$0xff]  ;;  %v1869_v34 = vpack.c.bf16 %v96_v31, %v95_v29  ;;  %v114_v36 = vld [vmem:[#allocation5 + $0xb8] sm:$0xff]  ;;  %p2352_p8 = pnand %p2351_p7, %p2345_p4 }
  0x53   :  { %1866 = vmatpush3.bf16.msra.mxu0 %v1865_v21  ;;  %v145_v37 = vld [vmem:[#allocation5 + $0x1b0] sm:$0xff]  ;;  %v1901_v38 = vpack.c.bf16 %v128_v33, %v127_v32  ;;  %v1871_v39 = vpack.c.bf16 %v114_v36, %v113_v35  ;;  %v146_v40 = vld [vmem:[#allocation5 + $0x1b8] sm:$0xff]  ;;  %v115_v46 = vld [vmem:[#allocation5 + $0xc0] sm:$0xff] }
  0x54   :  { %1898 = vmatpush3.bf16.msra.mxu1 %v1897_v25  ;;  %1868 = vmatprep.subr.bf16.mxu0 %v1867_v26  ;;  %v97_v41 = vld [vmem:[#allocation5 + $0x30] sm:$0xff]  ;;  %v98_v42 = vld [vmem:[#allocation5 + $0x38] sm:$0xff]  ;;  %v1903_v43 = vpack.c.bf16 %v146_v40, %v145_v37  ;;  %v116_v47 = vld [vmem:[#allocation5 + $0xc8] sm:$0xff] }
  0x55   :  { %1900 = vmatprep.subr.bf16.mxu1 %v1899_v30  ;;  %v129_v44 = vld [vmem:[#allocation5 + $0x130] sm:$0xff]  ;;  %v130_v45 = vld [vmem:[#allocation5 + $0x138] sm:$0xff]  ;;  %v147_v48 = vld [vmem:[#allocation5 + $0x1c0] sm:$0xff]  ;;  %v1873_v50 = vpack.c.bf16 %v98_v42, %v97_v41  ;;  %v1875_v52 = vpack.c.bf16 %v116_v47, %v115_v46 }
  0x56   :  { %v148_v49 = vld [vmem:[#allocation5 + $0x1c8] sm:$0xff]  ;;  %v1905_v51 = vpack.c.bf16 %v130_v45, %v129_v44  ;;  %v99_v53 = vld [vmem:[#allocation5 + $0x40] sm:$0xff]  ;;  %v117_v58 = vld [vmem:[#allocation5 + $0xd0] sm:$0xff] }
  0x57   :  { %1870 = vmatpush3.bf16.msra.mxu0 %v1869_v34  ;;  %v100_v54 = vld [vmem:[#allocation5 + $0x48] sm:$0xff]  ;;  %v131_v55 = vld [vmem:[#allocation5 + $0x140] sm:$0xff]  ;;  %v1907_v56 = vpack.c.bf16 %v148_v49, %v147_v48  ;;  %v118_v59 = vld [vmem:[#allocation5 + $0xd8] sm:$0xff] }
  0x58   :  { %1902 = vmatpush3.bf16.msra.mxu1 %v1901_v38  ;;  %1872 = vmatprep.subr.bf16.mxu0 %v1871_v39  ;;  %v132_v57 = vld [vmem:[#allocation5 + $0x148] sm:$0xff]  ;;  %v149_v60 = vld [vmem:[#allocation5 + $0x1d0] sm:$0xff]  ;;  %v150_v61 = vld [vmem:[#allocation5 + $0x1d8] sm:$0xff]  ;;  %v1877_v62 = vpack.c.bf16 %v100_v54, %v99_v53  ;;  %v1879_v0 = vpack.c.bf16 %v118_v59, %v117_v58 }
  0x59   :  { %1904 = vmatprep.subr.bf16.mxu1 %v1903_v43  ;;  %v1909_v63 = vpack.c.bf16 %v132_v57, %v131_v55  ;;  %v101_v1 = vld [vmem:[#allocation5 + $0x50] sm:$0xff]  ;;  %v102_v2 = vld [vmem:[#allocation5 + $0x58] sm:$0xff]  ;;  %v1911_v4 = vpack.c.bf16 %v150_v61, %v149_v60  ;;  %v119_v6 = vld [vmem:[#allocation5 + $0xe0] sm:$0xff] }
  0x5a   :  { %v133_v3 = vld [vmem:[#allocation5 + $0x150] sm:$0xff]  ;;  %v134_v5 = vld [vmem:[#allocation5 + $0x158] sm:$0xff]  ;;  %v120_v7 = vld [vmem:[#allocation5 + $0xe8] sm:$0xff]  ;;  %v1881_v10 = vpack.c.bf16 %v102_v2, %v101_v1 }
  0x5b   :  { %1874 = vmatpush3.bf16.msra.mxu0 %v1873_v50  ;;  %v151_v8 = vld [vmem:[#allocation5 + $0x1e0] sm:$0xff]  ;;  %v152_v9 = vld [vmem:[#allocation5 + $0x1e8] sm:$0xff]  ;;  %v1913_v13 = vpack.c.bf16 %v134_v5, %v133_v3  ;;  %v1883_v14 = vpack.c.bf16 %v120_v7, %v119_v6  ;;  %v70_v17 = vld [vmem:[#allocation2 + $0x18] sm:$0xff] }
  0x5c   :  { %1906 = vmatpush3.bf16.msra.mxu1 %v1905_v51  ;;  %1876 = vmatprep.subr.bf16.mxu0 %v1875_v52  ;;  %v103_v11 = vld [vmem:[#allocation5 + $0x60] sm:$0xff]  ;;  %v104_v12 = vld [vmem:[#allocation5 + $0x68] sm:$0xff]  ;;  %v1915_v18 = vpack.c.bf16 %v152_v9, %v151_v8  ;;  %v121_v20 = vld [vmem:[#allocation5 + $0xf0] sm:$0xff] }
  0x5d   :  { %1908 = vmatprep.subr.bf16.mxu1 %v1907_v56  ;;  %v135_v15 = vld [vmem:[#allocation5 + $0x160] sm:$0xff]  ;;  %v68_v16 = vld [vmem:[#allocation2 + $0x8] sm:$0xff]  ;;  %v122_v21 = vld [vmem:[#allocation5 + $0xf8] sm:$0xff]  ;;  %609 = vmatprep.mubr.f32.mxu1 %v70_v17  ;;  %v1885_v24 = vpack.c.bf16 %v104_v12, %v103_v11 }
  0x5e   :  { %v136_v19 = vld [vmem:[#allocation5 + $0x168] sm:$0xff]  ;;  %539 = vmatprep.mubr.f32.mxu0 %v68_v16  ;;  %v153_v22 = vld [vmem:[#allocation5 + $0x1f0] sm:$0xff]  ;;  %v154_v23 = vld [vmem:[#allocation5 + $0x1f8] sm:$0xff]  ;;  %v1887_v26 = vpack.c.bf16 %v122_v21, %v121_v20 }
  0x5f   :  { %1878 = vmatpush3.bf16.msra.mxu0 %v1877_v62  ;;  %v1917_v25 = vpack.c.bf16 %v136_v19, %v135_v15  ;;  %v105_v27 = vld [vmem:[#allocation5 + $0x70] sm:$0xff]  ;;  %v106_v28 = vld [vmem:[#allocation5 + $0x78] sm:$0xff]  ;;  %v1919_v30 = vpack.c.bf16 %v154_v23, %v153_v22  ;;  %v171_v32 = vld [vmem:[#allocation5 + $0x280] sm:$0xff] }
  0x60   :  { %1910 = vmatpush3.bf16.msra.mxu1 %v1909_v63  ;;  %1880 = vmatprep.subr.bf16.mxu0 %v1879_v0  ;;  %v137_v29 = vld [vmem:[#allocation5 + $0x170] sm:$0xff]  ;;  %v138_v31 = vld [vmem:[#allocation5 + $0x178] sm:$0xff]  ;;  %v172_v33 = vld [vmem:[#allocation5 + $0x288] sm:$0xff]  ;;  %v1889_v36 = vpack.c.bf16 %v106_v28, %v105_v27 }
  0x61   :  { %1912 = vmatprep.subr.bf16.mxu1 %v1911_v4  ;;  %v203_v34 = vld [vmem:[#allocation5 + $0x380] sm:$0xff]  ;;  %v204_v35 = vld [vmem:[#allocation5 + $0x388] sm:$0xff]  ;;  %v1921_v37 = vpack.c.bf16 %v138_v31, %v137_v29  ;;  %v1923_v38 = vpack.c.bf16 %v172_v33, %v171_v32  ;;  %v173_v44 = vld [vmem:[#allocation5 + $0x290] sm:$0xff] }
  0x62   :  { %v155_v39 = vld [vmem:[#allocation5 + $0x200] sm:$0xff]  ;;  %v156_v40 = vld [vmem:[#allocation5 + $0x208] sm:$0xff]  ;;  %v1955_v42 = vpack.c.bf16 %v204_v35, %v203_v34  ;;  %v174_v45 = vld [vmem:[#allocation5 + $0x298] sm:$0xff] }
  0x63   :  { %1882 = vmatpush3.bf16.msra.mxu0 %v1881_v10  ;;  %v187_v41 = vld [vmem:[#allocation5 + $0x300] sm:$0xff]  ;;  %v188_v43 = vld [vmem:[#allocation5 + $0x308] sm:$0xff]  ;;  %v205_v46 = vld [vmem:[#allocation5 + $0x390] sm:$0xff]  ;;  %v1925_v50 = vpack.c.bf16 %v156_v40, %v155_v39  ;;  %v1927_v52 = vpack.c.bf16 %v174_v45, %v173_v44 }
  0x64   :  { %1914 = vmatpush3.bf16.msra.mxu1 %v1913_v13  ;;  %1884 = vmatprep.subr.bf16.mxu0 %v1883_v14  ;;  %v206_v47 = vld [vmem:[#allocation5 + $0x398] sm:$0xff]  ;;  %v67_v48 = vld [vmem:[#allocation2] sm:$0xff]  ;;  %v69_v49 = vld [vmem:[#allocation2 + $0x10] sm:$0xff]  ;;  %v1957_v51 = vpack.c.bf16 %v188_v43, %v187_v41 }
  0x65   :  { %1916 = vmatprep.subr.bf16.mxu1 %v1915_v18  ;;  %v157_v53 = vld [vmem:[#allocation5 + $0x210] sm:$0xff]  ;;  %v158_v54 = vld [vmem:[#allocation5 + $0x218] sm:$0xff]  ;;  %v1959_v56 = vpack.c.bf16 %v206_v47, %v205_v46  ;;  %v175_v58 = vld [vmem:[#allocation5 + $0x2a0] sm:$0xff] }
  0x66   :  { %v189_v55 = vld [vmem:[#allocation5 + $0x310] sm:$0xff]  ;;  %v190_v57 = vld [vmem:[#allocation5 + $0x318] sm:$0xff]  ;;  %v176_v59 = vld [vmem:[#allocation5 + $0x2a8] sm:$0xff]  ;;  %v1929_v62 = vpack.c.bf16 %v158_v54, %v157_v53 }
  0x67   :  { %1886 = vmatpush3.bf16.msra.mxu0 %v1885_v24  ;;  %v207_v60 = vld [vmem:[#allocation5 + $0x3a0] sm:$0xff]  ;;  %v208_v61 = vld [vmem:[#allocation5 + $0x3a8] sm:$0xff]  ;;  %v1961_v63 = vpack.c.bf16 %v190_v57, %v189_v55  ;;  %v1931_v0 = vpack.c.bf16 %v176_v59, %v175_v58  ;;  %v177_v6 = vld [vmem:[#allocation5 + $0x2b0] sm:$0xff] }
  0x68   :  { %1918 = vmatpush3.bf16.msra.mxu1 %v1917_v25  ;;  %1888 = vmatprep.subr.bf16.mxu0 %v1887_v26  ;;  %v159_v1 = vld [vmem:[#allocation5 + $0x220] sm:$0xff]  ;;  %v160_v2 = vld [vmem:[#allocation5 + $0x228] sm:$0xff]  ;;  %v1963_v4 = vpack.c.bf16 %v208_v61, %v207_v60  ;;  %v178_v7 = vld [vmem:[#allocation5 + $0x2b8] sm:$0xff] }
  0x69   :  { %1920 = vmatprep.subr.bf16.mxu1 %v1919_v30  ;;  %v191_v3 = vld [vmem:[#allocation5 + $0x320] sm:$0xff]  ;;  %v192_v5 = vld [vmem:[#allocation5 + $0x328] sm:$0xff]  ;;  %v209_v8 = vld [vmem:[#allocation5 + $0x3b0] sm:$0xff]  ;;  %v1933_v10 = vpack.c.bf16 %v160_v2, %v159_v1  ;;  %v1935_v12 = vpack.c.bf16 %v178_v7, %v177_v6 }
  0x6a   :  { %v210_v9 = vld [vmem:[#allocation5 + $0x3b8] sm:$0xff]  ;;  %v1965_v11 = vpack.c.bf16 %v192_v5, %v191_v3  ;;  %v161_v13 = vld [vmem:[#allocation5 + $0x230] sm:$0xff]  ;;  %v179_v18 = vld [vmem:[#allocation5 + $0x2c0] sm:$0xff] }
  0x6b   :  { %1890 = vmatpush3.bf16.msra.mxu0 %v1889_v36  ;;  %v162_v14 = vld [vmem:[#allocation5 + $0x238] sm:$0xff]  ;;  %v193_v15 = vld [vmem:[#allocation5 + $0x330] sm:$0xff]  ;;  %v1967_v16 = vpack.c.bf16 %v210_v9, %v209_v8  ;;  %v180_v19 = vld [vmem:[#allocation5 + $0x2c8] sm:$0xff] }
  0x6c   :  { %1922 = vmatpush3.bf16.msra.mxu1 %v1921_v37  ;;  %1924 = vmatprep.subr.bf16.mxu0 %v1923_v38  ;;  %v194_v17 = vld [vmem:[#allocation5 + $0x338] sm:$0xff]  ;;  %v211_v20 = vld [vmem:[#allocation5 + $0x3c0] sm:$0xff]  ;;  %v212_v21 = vld [vmem:[#allocation5 + $0x3c8] sm:$0xff]  ;;  %v1937_v22 = vpack.c.bf16 %v162_v14, %v161_v13  ;;  %v1939_v26 = vpack.c.bf16 %v180_v19, %v179_v18 }
  0x6d   :  { %1956 = vmatprep.subr.bf16.mxu1 %v1955_v42  ;;  %v163_v23 = vld [vmem:[#allocation5 + $0x240] sm:$0xff]  ;;  %v72_v24 = vld [vmem:[#allocation2 + $0x28] sm:$0xff]  ;;  %v1969_v25 = vpack.c.bf16 %v194_v17, %v193_v15  ;;  %v74_v29 = vld [vmem:[#allocation2 + $0x38] sm:$0xff]  ;;  %v1971_v30 = vpack.c.bf16 %v212_v21, %v211_v20 }
  0x6e   :  { %540 = vmatmul.mubr.f32.vlgmr.msra.gmra.mrb[0].mxu0 %v67_v48  ;;  %v164_v27 = vld [vmem:[#allocation5 + $0x248] sm:$0xff]  ;;  %v195_v28 = vld [vmem:[#allocation5 + $0x340] sm:$0xff]  ;;  %v181_v32 = vld [vmem:[#allocation5 + $0x2d0] sm:$0xff] }
  0x6f   :  { %610 = vmatmul.mubr.f32.vlgmr.msra.gmra.mrb[0].mxu1 %v69_v49  ;;  %1926 = vmatpush3.bf16.msra.mxu0 %v1925_v50  ;;  %v196_v31 = vld [vmem:[#allocation5 + $0x348] sm:$0xff]  ;;  %v182_v33 = vld [vmem:[#allocation5 + $0x2d8] sm:$0xff]  ;;  %v213_v34 = vld [vmem:[#allocation5 + $0x3d0] sm:$0xff]  ;;  %v1941_v36 = vpack.c.bf16 %v164_v27, %v163_v23 }
  0x70   :  { %1958 = vmatpush3.bf16.msra.mxu1 %v1957_v51  ;;  %1928 = vmatprep.subr.bf16.mxu0 %v1927_v52  ;;  %v214_v35 = vld [vmem:[#allocation5 + $0x3d8] sm:$0xff]  ;;  %v1973_v37 = vpack.c.bf16 %v196_v31, %v195_v28  ;;  %v1943_v38 = vpack.c.bf16 %v182_v33, %v181_v32  ;;  %v165_v39 = vld [vmem:[#allocation5 + $0x250] sm:$0xff]  ;;  %v183_v44 = vld [vmem:[#allocation5 + $0x2e0] sm:$0xff] }
  0x71   :  { %1960 = vmatprep.subr.bf16.mxu1 %v1959_v56  ;;  %679 = vmatprep.mubr.f32.mxu0 %v72_v24  ;;  %v166_v40 = vld [vmem:[#allocation5 + $0x258] sm:$0xff]  ;;  %v197_v41 = vld [vmem:[#allocation5 + $0x350] sm:$0xff]  ;;  %v1975_v42 = vpack.c.bf16 %v214_v35, %v213_v34  ;;  %v184_v45 = vld [vmem:[#allocation5 + $0x2e8] sm:$0xff] }
  0x72   :  { %749 = vmatprep.mubr.f32.mxu1 %v74_v29  ;;  %v198_v43 = vld [vmem:[#allocation5 + $0x358] sm:$0xff]  ;;  %v215_v46 = vld [vmem:[#allocation5 + $0x3e0] sm:$0xff]  ;;  %v216_v47 = vld [vmem:[#allocation5 + $0x3e8] sm:$0xff]  ;;  %v1945_v48 = vpack.c.bf16 %v166_v40, %v165_v39  ;;  %v1947_v50 = vpack.c.bf16 %v184_v45, %v183_v44 }
  0x73   :  { %1930 = vmatpush3.bf16.msra.mxu0 %v1929_v62  ;;  %v1977_v49 = vpack.c.bf16 %v198_v43, %v197_v41  ;;  %v167_v51 = vld [vmem:[#allocation5 + $0x260] sm:$0xff]  ;;  %v168_v52 = vld [vmem:[#allocation5 + $0x268] sm:$0xff]  ;;  %v1979_v54 = vpack.c.bf16 %v216_v47, %v215_v46  ;;  %v185_v56 = vld [vmem:[#allocation5 + $0x2f0] sm:$0xff] }
  0x74   :  { %1962 = vmatpush3.bf16.msra.mxu1 %v1961_v63  ;;  %1932 = vmatprep.subr.bf16.mxu0 %v1931_v0  ;;  %v199_v53 = vld [vmem:[#allocation5 + $0x360] sm:$0xff]  ;;  %v200_v55 = vld [vmem:[#allocation5 + $0x368] sm:$0xff]  ;;  %v186_v57 = vld [vmem:[#allocation5 + $0x2f8] sm:$0xff]  ;;  %v1949_v60 = vpack.c.bf16 %v168_v52, %v167_v51 }
  0x75   :  { %1964 = vmatprep.subr.bf16.mxu1 %v1963_v4  ;;  %v217_v58 = vld [vmem:[#allocation5 + $0x3f0] sm:$0xff]  ;;  %v218_v59 = vld [vmem:[#allocation5 + $0x3f8] sm:$0xff]  ;;  %v1981_v61 = vpack.c.bf16 %v200_v55, %v199_v53  ;;  %v1951_v62 = vpack.c.bf16 %v186_v57, %v185_v56  ;;  %v235_v4 = vld [vmem:[#allocation5 + $0x480] sm:$0xff] }
  0x76   :  { %v169_v63 = vld [vmem:[#allocation5 + $0x270] sm:$0xff]  ;;  %v170_v0 = vld [vmem:[#allocation5 + $0x278] sm:$0xff]  ;;  %v1983_v2 = vpack.c.bf16 %v218_v59, %v217_v58  ;;  %v236_v5 = vld [vmem:[#allocation5 + $0x488] sm:$0xff] }
  0x77   :  { %1934 = vmatpush3.bf16.msra.mxu0 %v1933_v10  ;;  %v201_v1 = vld [vmem:[#allocation5 + $0x370] sm:$0xff]  ;;  %v202_v3 = vld [vmem:[#allocation5 + $0x378] sm:$0xff]  ;;  %v267_v6 = vld [vmem:[#allocation5 + $0x580] sm:$0xff]  ;;  %v1953_v8 = vpack.c.bf16 %v170_v0, %v169_v63  ;;  %v1987_v10 = vpack.c.bf16 %v236_v5, %v235_v4 }
  0x78   :  { %1966 = vmatpush3.bf16.msra.mxu1 %v1965_v11  ;;  %1936 = vmatprep.subr.bf16.mxu0 %v1935_v12  ;;  %v268_v7 = vld [vmem:[#allocation5 + $0x588] sm:$0xff]  ;;  %v1985_v9 = vpack.c.bf16 %v202_v3, %v201_v1  ;;  %v219_v11 = vld [vmem:[#allocation5 + $0x400] sm:$0xff]  ;;  %v238_v17 = vld [vmem:[#allocation5 + $0x498] sm:$0xff] }
  0x79   :  { %1968 = vmatprep.subr.bf16.mxu1 %v1967_v16  ;;  %v220_v12 = vld [vmem:[#allocation5 + $0x408] sm:$0xff]  ;;  %v251_v13 = vld [vmem:[#allocation5 + $0x500] sm:$0xff]  ;;  %v2019_v14 = vpack.c.bf16 %v268_v7, %v267_v6  ;;  %v237_v16 = vld [vmem:[#allocation5 + $0x490] sm:$0xff] }
  0x7a   :  { %v252_v15 = vld [vmem:[#allocation5 + $0x508] sm:$0xff]  ;;  %v269_v18 = vld [vmem:[#allocation5 + $0x590] sm:$0xff]  ;;  %v270_v19 = vld [vmem:[#allocation5 + $0x598] sm:$0xff]  ;;  %v1989_v21 = vpack.c.bf16 %v220_v12, %v219_v11  ;;  %v1991_v24 = vpack.c.bf16 %v238_v17, %v237_v16 }
  0x7b   :  { %1938 = vmatpush3.bf16.msra.mxu0 %v1937_v22  ;;  %v71_v20 = vld [vmem:[#allocation2 + $0x20] sm:$0xff]  ;;  %v73_v22 = vld [vmem:[#allocation2 + $0x30] sm:$0xff]  ;;  %v2021_v23 = vpack.c.bf16 %v252_v15, %v251_v13  ;;  %v2023_v28 = vpack.c.bf16 %v270_v19, %v269_v18  ;;  %v254_v29 = vld [vmem:[#allocation5 + $0x518] sm:$0xff] }
  0x7c   :  { %1970 = vmatpush3.bf16.msra.mxu1 %v1969_v25  ;;  %1940 = vmatprep.subr.bf16.mxu0 %v1939_v26  ;;  %v221_v25 = vld [vmem:[#allocation5 + $0x410] sm:$0xff]  ;;  %v222_v26 = vld [vmem:[#allocation5 + $0x418] sm:$0xff]  ;;  %v240_v31 = vld [vmem:[#allocation5 + $0x4a8] sm:$0xff] }
  0x7d   :  { %1972 = vmatprep.subr.bf16.mxu1 %v1971_v30  ;;  %v253_v27 = vld [vmem:[#allocation5 + $0x510] sm:$0xff]  ;;  %v239_v30 = vld [vmem:[#allocation5 + $0x4a0] sm:$0xff]  ;;  %v272_v33 = vld [vmem:[#allocation5 + $0x5a8] sm:$0xff]  ;;  %v1993_v35 = vpack.c.bf16 %v222_v26, %v221_v25 }
  0x7e   :  { %v271_v32 = vld [vmem:[#allocation5 + $0x5a0] sm:$0xff]  ;;  %v76_v34 = vld [vmem:[#allocation2 + $0x48] sm:$0xff]  ;;  %v241_v44 = vld [vmem:[#allocation5 + $0x4b0] sm:$0xff] }
  0x7f   :  { %1942 = vmatpush3.bf16.msra.mxu0 %v1941_v36  ;;  %v78_v36 = vld [vmem:[#allocation2 + $0x58] sm:$0xff]  ;;  %v223_v39 = vld [vmem:[#allocation5 + $0x420] sm:$0xff]  ;;  %v224_v40 = vld [vmem:[#allocation5 + $0x428] sm:$0xff] }
  0x80   :  { %1974 = vmatpush3.bf16.msra.mxu1 %v1973_v37  ;;  %1944 = vmatprep.subr.bf16.mxu0 %v1943_v38  ;;  %v2025_v37 = vpack.c.bf16 %v254_v29, %v253_v27  ;;  %v1995_v38 = vpack.c.bf16 %v240_v31, %v239_v30  ;;  %v255_v41 = vld [vmem:[#allocation5 + $0x520] sm:$0xff]  ;;  %v256_v43 = vld [vmem:[#allocation5 + $0x528] sm:$0xff]  ;;  %v242_v45 = vld [vmem:[#allocation5 + $0x4b8] sm:$0xff] }
  0x81   :  { %1976 = vmatprep.subr.bf16.mxu1 %v1975_v42  ;;  %v2027_v42 = vpack.c.bf16 %v272_v33, %v271_v32  ;;  %v273_v46 = vld [vmem:[#allocation5 + $0x5b0] sm:$0xff]  ;;  %v274_v47 = vld [vmem:[#allocation5 + $0x5b8] sm:$0xff]  ;;  %v243_v56 = vld [vmem:[#allocation5 + $0x4c0] sm:$0xff] }
  0x82   :  { %v225_v51 = vld [vmem:[#allocation5 + $0x430] sm:$0xff]  ;;  %v226_v52 = vld [vmem:[#allocation5 + $0x438] sm:$0xff]  ;;  %v244_v57 = vld [vmem:[#allocation5 + $0x4c8] sm:$0xff] }
  0x83   :  { %1946 = vmatpush3.bf16.msra.mxu0 %v1945_v48  ;;  %v1997_v48 = vpack.c.bf16 %v224_v40, %v223_v39  ;;  %v257_v53 = vld [vmem:[#allocation5 + $0x530] sm:$0xff]  ;;  %v258_v55 = vld [vmem:[#allocation5 + $0x538] sm:$0xff]  ;;  %v275_v58 = vld [vmem:[#allocation5 + $0x5c0] sm:$0xff] }
  0x84   :  { %1978 = vmatpush3.bf16.msra.mxu1 %v1977_v49  ;;  %1948 = vmatprep.subr.bf16.mxu0 %v1947_v50  ;;  %v2029_v49 = vpack.c.bf16 %v256_v43, %v255_v41  ;;  %v1999_v50 = vpack.c.bf16 %v242_v45, %v241_v44  ;;  %v276_v59 = vld [vmem:[#allocation5 + $0x5c8] sm:$0xff]  ;;  %v227_v63 = vld [vmem:[#allocation5 + $0x440] sm:$0xff]  ;;  %v245_v4 = vld [vmem:[#allocation5 + $0x4d0] sm:$0xff] }
  0x85   :  { %1980 = vmatprep.subr.bf16.mxu1 %v1979_v54  ;;  %v2031_v54 = vpack.c.bf16 %v274_v47, %v273_v46  ;;  %v228_v0 = vld [vmem:[#allocation5 + $0x448] sm:$0xff]  ;;  %v259_v1 = vld [vmem:[#allocation5 + $0x540] sm:$0xff]  ;;  %v246_v5 = vld [vmem:[#allocation5 + $0x4d8] sm:$0xff] }
  0x86   :  { %v260_v3 = vld [vmem:[#allocation5 + $0x548] sm:$0xff]  ;;  %v277_v6 = vld [vmem:[#allocation5 + $0x5d0] sm:$0xff]  ;;  %v278_v7 = vld [vmem:[#allocation5 + $0x5d8] sm:$0xff] }
  0x87   :  { %1950 = vmatpush3.bf16.msra.mxu0 %v1949_v60  ;;  %v2001_v60 = vpack.c.bf16 %v226_v52, %v225_v51  ;;  %v229_v11 = vld [vmem:[#allocation5 + $0x450] sm:$0xff]  ;;  %v230_v12 = vld [vmem:[#allocation5 + $0x458] sm:$0xff]  ;;  %v247_v16 = vld [vmem:[#allocation5 + $0x4e0] sm:$0xff] }
  0x88   :  { %1982 = vmatpush3.bf16.msra.mxu1 %v1981_v61  ;;  %1952 = vmatprep.subr.bf16.mxu0 %v1951_v62  ;;  %v2033_v61 = vpack.c.bf16 %v258_v55, %v257_v53  ;;  %v2003_v62 = vpack.c.bf16 %v244_v57, %v243_v56  ;;  %v261_v13 = vld [vmem:[#allocation5 + $0x550] sm:$0xff]  ;;  %v262_v15 = vld [vmem:[#allocation5 + $0x558] sm:$0xff]  ;;  %v248_v17 = vld [vmem:[#allocation5 + $0x4e8] sm:$0xff] }
  0x89   :  { %1984 = vmatprep.subr.bf16.mxu1 %v1983_v2  ;;  %v2035_v2 = vpack.c.bf16 %v276_v59, %v275_v58  ;;  %v279_v18 = vld [vmem:[#allocation5 + $0x5e0] sm:$0xff]  ;;  %v280_v19 = vld [vmem:[#allocation5 + $0x5e8] sm:$0xff]  ;;  %v250_v29 = vld [vmem:[#allocation5 + $0x4f8] sm:$0xff] }
  0x8a   :  { %v263_v25 = vld [vmem:[#allocation5 + $0x560] sm:$0xff]  ;;  %v2043_v26 = vpack.c.bf16 %v280_v19, %v279_v18  ;;  %v264_v27 = vld [vmem:[#allocation5 + $0x568] sm:$0xff]  ;;  %v281_v30 = vld [vmem:[#allocation5 + $0x5f0] sm:$0xff] }
  0x8b   :  { %1954 = vmatpush3.bf16.msra.mxu0 %v1953_v8  ;;  %v2005_v8 = vpack.c.bf16 %v228_v0, %v227_v63  ;;  %v282_v31 = vld [vmem:[#allocation5 + $0x5f8] sm:$0xff]  ;;  %v2045_v33 = vpack.c.bf16 %v264_v27, %v263_v25  ;;  %v299_v40 = vld [vmem:[#allocation5 + $0x680] sm:$0xff]  ;;  %v300_v41 = vld [vmem:[#allocation5 + $0x688] sm:$0xff] }
  0x8c   :  { %1986 = vmatpush3.bf16.msra.mxu1 %v1985_v9  ;;  %1988 = vmatprep.subr.bf16.mxu0 %v1987_v10  ;;  %v2037_v9 = vpack.c.bf16 %v260_v3, %v259_v1  ;;  %v2007_v10 = vpack.c.bf16 %v246_v5, %v245_v4  ;;  %v266_v39 = vld [vmem:[#allocation5 + $0x578] sm:$0xff]  ;;  %v332_v43 = vld [vmem:[#allocation5 + $0x788] sm:$0xff]  ;;  %v2051_v46 = vpack.c.bf16 %v300_v41, %v299_v40  ;;  %v283_v47 = vld [vmem:[#allocation5 + $0x600] sm:$0xff] }
  0x8d   :  { %2020 = vmatprep.subr.bf16.mxu1 %v2019_v14  ;;  %v2039_v14 = vpack.c.bf16 %v278_v7, %v277_v6  ;;  %v316_v51 = vld [vmem:[#allocation5 + $0x708] sm:$0xff]  ;;  %v301_v52 = vld [vmem:[#allocation5 + $0x690] sm:$0xff]  ;;  %v302_v53 = vld [vmem:[#allocation5 + $0x698] sm:$0xff] }
  0x8e   :  { %680 = vmatmul.mubr.f32.vlgmr.msra.gmra.mrb[2].mxu0 %v71_v20  ;;  %v2009_v20 = vpack.c.bf16 %v230_v12, %v229_v11  ;;  %v334_v55 = vld [vmem:[#allocation5 + $0x798] sm:$0xff]  ;;  %v75_v56 = vld [vmem:[#allocation2 + $0x40] sm:$0xff]  ;;  %v77_v58 = vld [vmem:[#allocation2 + $0x50] sm:$0xff] }
  0x8f   :  { %1990 = vmatpush3.bf16.msra.mxu0 %v1989_v21  ;;  %750 = vmatmul.mubr.f32.vlgmr.msra.gmra.mrb[2].mxu1 %v73_v22  ;;  %v2041_v21 = vpack.c.bf16 %v262_v15, %v261_v13  ;;  %v2011_v22 = vpack.c.bf16 %v248_v17, %v247_v16  ;;  %v317_v63 = vld [vmem:[#allocation5 + $0x710] sm:$0xff]  ;;  %v318_v1 = vld [vmem:[#allocation5 + $0x718] sm:$0xff]  ;;  %v304_v3 = vld [vmem:[#allocation5 + $0x6a8] sm:$0xff] }
  0x90   :  { %2022 = vmatpush3.bf16.msra.mxu1 %v2021_v23  ;;  %1992 = vmatprep.subr.bf16.mxu0 %v1991_v24  ;;  %v231_v23 = vld [vmem:[#allocation5 + $0x460] sm:$0xff]  ;;  %v232_v24 = vld [vmem:[#allocation5 + $0x468] sm:$0xff]  ;;  %v305_v16 = vld [vmem:[#allocation5 + $0x6b0] sm:$0xff] }
  0x91   :  { %2024 = vmatprep.subr.bf16.mxu1 %v2023_v28  ;;  %819 = vmatprep.mubr.f32.mxu0 %v76_v34  ;;  %v249_v28 = vld [vmem:[#allocation5 + $0x4f0] sm:$0xff]  ;;  %v2013_v32 = vpack.c.bf16 %v232_v24, %v231_v23  ;;  %v335_v4 = vld [vmem:[#allocation5 + $0x7a0] sm:$0xff]  ;;  %v336_v5 = vld [vmem:[#allocation5 + $0x7a8] sm:$0xff] }
  0x92   :  { %889 = vmatprep.mubr.f32.mxu1 %v78_v36  ;;  %v2015_v34 = vpack.c.bf16 %v250_v29, %v249_v28  ;;  %v234_v36 = vld [vmem:[#allocation5 + $0x478] sm:$0xff]  ;;  %v80_v6 = vld [vmem:[#allocation2 + $0x68] sm:$0xff]  ;;  %v287_v11 = vld [vmem:[#allocation5 + $0x620] sm:$0xff] }
  0x93   :  { %1994 = vmatpush3.bf16.msra.mxu0 %v1993_v35  ;;  %v233_v35 = vld [vmem:[#allocation5 + $0x470] sm:$0xff]  ;;  %v288_v12 = vld [vmem:[#allocation5 + $0x628] sm:$0xff]  ;;  %v319_v13 = vld [vmem:[#allocation5 + $0x720] sm:$0xff] }
  0x94   :  { %2026 = vmatpush3.bf16.msra.mxu1 %v2025_v37  ;;  %1996 = vmatprep.subr.bf16.mxu0 %v1995_v38  ;;  %v265_v37 = vld [vmem:[#allocation5 + $0x570] sm:$0xff]  ;;  %v2047_v38 = vpack.c.bf16 %v282_v31, %v281_v30  ;;  %v2017_v44 = vpack.c.bf16 %v234_v36, %v233_v35  ;;  %v320_v15 = vld [vmem:[#allocation5 + $0x728] sm:$0xff]  ;;  %v306_v17 = vld [vmem:[#allocation5 + $0x6b8] sm:$0xff] }
  0x95   :  { %2028 = vmatprep.subr.bf16.mxu1 %v2027_v42  ;;  %v331_v42 = vld [vmem:[#allocation5 + $0x780] sm:$0xff]  ;;  %v2049_v45 = vpack.c.bf16 %v266_v39, %v265_v37  ;;  %v337_v18 = vld [vmem:[#allocation5 + $0x7b0] sm:$0xff]  ;;  %v338_v19 = vld [vmem:[#allocation5 + $0x7b8] sm:$0xff] }
  0x96   :  { %v289_v23 = vld [vmem:[#allocation5 + $0x630] sm:$0xff]  ;;  %v290_v24 = vld [vmem:[#allocation5 + $0x638] sm:$0xff]  ;;  %v307_v28 = vld [vmem:[#allocation5 + $0x6c0] sm:$0xff] }
  0x97   :  { %1998 = vmatpush3.bf16.msra.mxu0 %v1997_v48  ;;  %v284_v48 = vld [vmem:[#allocation5 + $0x608] sm:$0xff]  ;;  %v321_v25 = vld [vmem:[#allocation5 + $0x730] sm:$0xff]  ;;  %v322_v27 = vld [vmem:[#allocation5 + $0x738] sm:$0xff] }
  0x98   :  { %2030 = vmatpush3.bf16.msra.mxu1 %v2029_v49  ;;  %2000 = vmatprep.subr.bf16.mxu0 %v1999_v50  ;;  %v315_v49 = vld [vmem:[#allocation5 + $0x700] sm:$0xff]  ;;  %v2083_v50 = vpack.c.bf16 %v332_v43, %v331_v42  ;;  %v2053_v57 = vpack.c.bf16 %v284_v48, %v283_v47  ;;  %v308_v29 = vld [vmem:[#allocation5 + $0x6c8] sm:$0xff]  ;;  %v309_v40 = vld [vmem:[#allocation5 + $0x6d0] sm:$0xff] }
  0x99   :  { %2032 = vmatprep.subr.bf16.mxu1 %v2031_v54  ;;  %v333_v54 = vld [vmem:[#allocation5 + $0x790] sm:$0xff]  ;;  %v2085_v59 = vpack.c.bf16 %v316_v51, %v315_v49  ;;  %v339_v30 = vld [vmem:[#allocation5 + $0x7c0] sm:$0xff]  ;;  %v340_v31 = vld [vmem:[#allocation5 + $0x7c8] sm:$0xff] }
  0x9a   :  { %v2087_v0 = vpack.c.bf16 %v334_v55, %v333_v54  ;;  %v291_v35 = vld [vmem:[#allocation5 + $0x640] sm:$0xff]  ;;  %v292_v36 = vld [vmem:[#allocation5 + $0x648] sm:$0xff]  ;;  %v310_v41 = vld [vmem:[#allocation5 + $0x6d8] sm:$0xff] }
  0x9b   :  { %2002 = vmatpush3.bf16.msra.mxu0 %v2001_v60  ;;  %v2055_v60 = vpack.c.bf16 %v302_v53, %v301_v52  ;;  %v323_v37 = vld [vmem:[#allocation5 + $0x740] sm:$0xff]  ;;  %v324_v39 = vld [vmem:[#allocation5 + $0x748] sm:$0xff]  ;;  %v341_v42 = vld [vmem:[#allocation5 + $0x7d0] sm:$0xff] }
  0x9c   :  { %2034 = vmatpush3.bf16.msra.mxu1 %v2033_v61  ;;  %2004 = vmatprep.subr.bf16.mxu0 %v2003_v62  ;;  %v285_v61 = vld [vmem:[#allocation5 + $0x610] sm:$0xff]  ;;  %v286_v62 = vld [vmem:[#allocation5 + $0x618] sm:$0xff]  ;;  %v311_v52 = vld [vmem:[#allocation5 + $0x6e0] sm:$0xff] }
  0x9d   :  { %2036 = vmatprep.subr.bf16.mxu1 %v2035_v2  ;;  %v303_v2 = vld [vmem:[#allocation5 + $0x6a0] sm:$0xff]  ;;  %v2057_v7 = vpack.c.bf16 %v286_v62, %v285_v61  ;;  %v342_v43 = vld [vmem:[#allocation5 + $0x7d8] sm:$0xff]  ;;  %v293_v47 = vld [vmem:[#allocation5 + $0x650] sm:$0xff] }
  0x9e   :  { %v294_v48 = vld [vmem:[#allocation5 + $0x658] sm:$0xff]  ;;  %v325_v49 = vld [vmem:[#allocation5 + $0x750] sm:$0xff]  ;;  %v312_v53 = vld [vmem:[#allocation5 + $0x6e8] sm:$0xff] }
  0x9f   :  { %2006 = vmatpush3.bf16.msra.mxu0 %v2005_v8  ;;  %v82_v8 = vld [vmem:[#allocation2 + $0x78] sm:$0xff]  ;;  %v343_v54 = vld [vmem:[#allocation5 + $0x7e0] sm:$0xff]  ;;  %v344_v55 = vld [vmem:[#allocation5 + $0x7e8] sm:$0xff] }
  0xa0   :  { %2038 = vmatpush3.bf16.msra.mxu1 %v2037_v9  ;;  %2008 = vmatprep.subr.bf16.mxu0 %v2007_v10  ;;  %v2089_v9 = vpack.c.bf16 %v318_v1, %v317_v63  ;;  %v2059_v10 = vpack.c.bf16 %v304_v3, %v303_v2  ;;  %v326_v51 = vld [vmem:[#allocation5 + $0x758] sm:$0xff]  ;;  %v327_v61 = vld [vmem:[#allocation5 + $0x760] sm:$0xff]  ;;  %v2107_v62 = vpack.c.bf16 %v344_v55, %v343_v54  ;;  %v328_v63 = vld [vmem:[#allocation5 + $0x768] sm:$0xff] }
  0xa1   :  { %2040 = vmatprep.subr.bf16.mxu1 %v2039_v14  ;;  %v2091_v14 = vpack.c.bf16 %v336_v5, %v335_v4  ;;  %v314_v1 = vld [vmem:[#allocation5 + $0x6f8] sm:$0xff]  ;;  %v345_v2 = vld [vmem:[#allocation5 + $0x7f0] sm:$0xff]  ;;  %v2109_v5 = vpack.c.bf16 %v328_v63, %v327_v61 }
  0xa2   :  { %v346_v3 = vld [vmem:[#allocation5 + $0x7f8] sm:$0xff]  ;;  %v401_v54 = vld [vmem:[#allocation5 + $0x9b0] sm:$0xff] }
  0xa3   :  { %2010 = vmatpush3.bf16.msra.mxu0 %v2009_v20  ;;  %v2061_v20 = vpack.c.bf16 %v288_v12, %v287_v11  ;;  %v330_v11 = vld [vmem:[#allocation5 + $0x778] sm:$0xff]  ;;  %v363_v12 = vld [vmem:[#allocation5 + $0x880] sm:$0xff]  ;;  %v385_v61 = vld [vmem:[#allocation5 + $0x930] sm:$0xff] }
  0xa4   :  { %2042 = vmatpush3.bf16.msra.mxu1 %v2041_v21  ;;  %2012 = vmatprep.subr.bf16.mxu0 %v2011_v22  ;;  %v2093_v21 = vpack.c.bf16 %v320_v15, %v319_v13  ;;  %v2063_v22 = vpack.c.bf16 %v306_v17, %v305_v16  ;;  %v364_v13 = vld [vmem:[#allocation5 + $0x888] sm:$0xff]  ;;  %v402_v55 = vld [vmem:[#allocation5 + $0x9b8] sm:$0xff] }
  0xa5   :  { %2044 = vmatprep.subr.bf16.mxu1 %v2043_v26  ;;  %v2095_v26 = vpack.c.bf16 %v338_v19, %v337_v18  ;;  %v396_v15 = vld [vmem:[#allocation5 + $0x988] sm:$0xff]  ;;  %v2115_v18 = vpack.c.bf16 %v364_v13, %v363_v12  ;;  %v347_v19 = vld [vmem:[#allocation5 + $0x800] sm:$0xff]  ;;  %v386_v63 = vld [vmem:[#allocation5 + $0x938] sm:$0xff] }
  0xa6   :  { %v373_v12 = vld [vmem:[#allocation5 + $0x8d0] sm:$0xff]  ;;  %v374_v13 = vld [vmem:[#allocation5 + $0x8d8] sm:$0xff] }
  0xa7   :  { %2014 = vmatpush3.bf16.msra.mxu0 %v2013_v32  ;;  %v2065_v32 = vpack.c.bf16 %v290_v24, %v289_v23  ;;  %v380_v23 = vld [vmem:[#allocation5 + $0x908] sm:$0xff]  ;;  %v365_v24 = vld [vmem:[#allocation5 + $0x890] sm:$0xff] }
  0xa8   :  { %2046 = vmatpush3.bf16.msra.mxu1 %v2045_v33  ;;  %2016 = vmatprep.subr.bf16.mxu0 %v2015_v34  ;;  %v2097_v33 = vpack.c.bf16 %v322_v27, %v321_v25  ;;  %v2067_v34 = vpack.c.bf16 %v308_v29, %v307_v28  ;;  %v366_v25 = vld [vmem:[#allocation5 + $0x898] sm:$0xff]  ;;  %v79_v28 = vld [vmem:[#allocation2 + $0x60] sm:$0xff] }
  0xa9   :  { %2048 = vmatprep.subr.bf16.mxu1 %v2047_v38  ;;  %v2099_v38 = vpack.c.bf16 %v340_v31, %v339_v30  ;;  %v398_v27 = vld [vmem:[#allocation5 + $0x998] sm:$0xff]  ;;  %v81_v30 = vld [vmem:[#allocation2 + $0x70] sm:$0xff] }
  0xab   :  { %2018 = vmatpush3.bf16.msra.mxu0 %v2017_v44  ;;  %v2069_v44 = vpack.c.bf16 %v292_v36, %v291_v35  ;;  %v381_v35 = vld [vmem:[#allocation5 + $0x910] sm:$0xff] }
  0xac   :  { %2050 = vmatpush3.bf16.msra.mxu1 %v2049_v45  ;;  %2052 = vmatprep.subr.bf16.mxu0 %v2051_v46  ;;  %v2101_v45 = vpack.c.bf16 %v324_v39, %v323_v37  ;;  %v2071_v46 = vpack.c.bf16 %v310_v41, %v309_v40  ;;  %v382_v37 = vld [vmem:[#allocation5 + $0x918] sm:$0xff]  ;;  %v368_v39 = vld [vmem:[#allocation5 + $0x8a8] sm:$0xff]  ;;  %v399_v40 = vld [vmem:[#allocation5 + $0x9a0] sm:$0xff] }
  0xad   :  { %2084 = vmatprep.subr.bf16.mxu1 %v2083_v50  ;;  %v2103_v50 = vpack.c.bf16 %v342_v43, %v341_v42  ;;  %v400_v41 = vld [vmem:[#allocation5 + $0x9a8] sm:$0xff] }
  0xae   :  { %820 = vmatmul.mubr.f32.vlgmr.msra.gmra.mrb[4].mxu0 %v75_v56  ;;  %v2073_v56 = vpack.c.bf16 %v294_v48, %v293_v47  ;;  %v84_v42 = vld [vmem:[#allocation2 + $0x88] sm:$0xff]  ;;  %v351_v47 = vld [vmem:[#allocation5 + $0x820] sm:$0xff] }
  0xaf   :  { %2054 = vmatpush3.bf16.msra.mxu0 %v2053_v57  ;;  %890 = vmatmul.mubr.f32.vlgmr.msra.gmra.mrb[4].mxu1 %v77_v58  ;;  %v2105_v57 = vpack.c.bf16 %v326_v51, %v325_v49  ;;  %v2075_v58 = vpack.c.bf16 %v312_v53, %v311_v52  ;;  %v352_v48 = vld [vmem:[#allocation5 + $0x828] sm:$0xff]  ;;  %v383_v49 = vld [vmem:[#allocation5 + $0x920] sm:$0xff]  ;;  %v369_v52 = vld [vmem:[#allocation5 + $0x8b0] sm:$0xff] }
  0xb0   :  { %2086 = vmatpush3.bf16.msra.mxu1 %v2085_v59  ;;  %2056 = vmatprep.subr.bf16.mxu0 %v2055_v60  ;;  %v295_v59 = vld [vmem:[#allocation5 + $0x660] sm:$0xff]  ;;  %v296_v60 = vld [vmem:[#allocation5 + $0x668] sm:$0xff]  ;;  %v370_v53 = vld [vmem:[#allocation5 + $0x8b8] sm:$0xff] }
  0xb1   :  { %2088 = vmatprep.subr.bf16.mxu1 %v2087_v0  ;;  %959 = vmatprep.mubr.f32.mxu0 %v80_v6  ;;  %v313_v0 = vld [vmem:[#allocation5 + $0x6f0] sm:$0xff]  ;;  %v2077_v4 = vpack.c.bf16 %v296_v60, %v295_v59  ;;  %v384_v51 = vld [vmem:[#allocation5 + $0x928] sm:$0xff]  ;;  %v354_v60 = vld [vmem:[#allocation5 + $0x838] sm:$0xff] }
  0xb2   :  { %1029 = vmatprep.mubr.f32.mxu1 %v82_v8  ;;  %v2079_v6 = vpack.c.bf16 %v314_v1, %v313_v0  ;;  %v298_v8 = vld [vmem:[#allocation5 + $0x678] sm:$0xff]  ;;  %v353_v59 = vld [vmem:[#allocation5 + $0x830] sm:$0xff]  ;;  %v371_v0 = vld [vmem:[#allocation5 + $0x8c0] sm:$0xff] }
  0xb3   :  { %2058 = vmatpush3.bf16.msra.mxu0 %v2057_v7  ;;  %v297_v7 = vld [vmem:[#allocation5 + $0x670] sm:$0xff]  ;;  %v372_v1 = vld [vmem:[#allocation5 + $0x8c8] sm:$0xff] }
  0xb4   :  { %2090 = vmatpush3.bf16.msra.mxu1 %v2089_v9  ;;  %2060 = vmatprep.subr.bf16.mxu0 %v2059_v10  ;;  %v329_v9 = vld [vmem:[#allocation5 + $0x770] sm:$0xff]  ;;  %v2111_v10 = vpack.c.bf16 %v346_v3, %v345_v2  ;;  %v2081_v16 = vpack.c.bf16 %v298_v8, %v297_v7  ;;  %v403_v2 = vld [vmem:[#allocation5 + $0x9c0] sm:$0xff]  ;;  %v404_v3 = vld [vmem:[#allocation5 + $0x9c8] sm:$0xff] }
  0xb5   :  { %2092 = vmatprep.subr.bf16.mxu1 %v2091_v14  ;;  %v395_v14 = vld [vmem:[#allocation5 + $0x980] sm:$0xff]  ;;  %v2113_v17 = vpack.c.bf16 %v330_v11, %v329_v9  ;;  %v356_v8 = vld [vmem:[#allocation5 + $0x848] sm:$0xff] }
  0xb6   :  { %v355_v7 = vld [vmem:[#allocation5 + $0x840] sm:$0xff]  ;;  %v388_v11 = vld [vmem:[#allocation5 + $0x948] sm:$0xff] }
  0xb7   :  { %2062 = vmatpush3.bf16.msra.mxu0 %v2061_v20  ;;  %v348_v20 = vld [vmem:[#allocation5 + $0x808] sm:$0xff]  ;;  %v387_v9 = vld [vmem:[#allocation5 + $0x940] sm:$0xff] }
  0xb8   :  { %2094 = vmatpush3.bf16.msra.mxu1 %v2093_v21  ;;  %2064 = vmatprep.subr.bf16.mxu0 %v2063_v22  ;;  %v379_v21 = vld [vmem:[#allocation5 + $0x900] sm:$0xff]  ;;  %v2147_v22 = vpack.c.bf16 %v396_v15, %v395_v14  ;;  %v2117_v29 = vpack.c.bf16 %v348_v20, %v347_v19  ;;  %v405_v14 = vld [vmem:[#allocation5 + $0x9d0] sm:$0xff]  ;;  %v406_v15 = vld [vmem:[#allocation5 + $0x9d8] sm:$0xff] }
  0xb9   :  { %2096 = vmatprep.subr.bf16.mxu1 %v2095_v26  ;;  %v397_v26 = vld [vmem:[#allocation5 + $0x990] sm:$0xff]  ;;  %v2149_v31 = vpack.c.bf16 %v380_v23, %v379_v21  ;;  %v358_v20 = vld [vmem:[#allocation5 + $0x858] sm:$0xff] }
  0xba   :  { %v2151_v36 = vpack.c.bf16 %v398_v27, %v397_v26  ;;  %v357_v19 = vld [vmem:[#allocation5 + $0x850] sm:$0xff]  ;;  %v390_v23 = vld [vmem:[#allocation5 + $0x958] sm:$0xff]  ;;  %v407_v26 = vld [vmem:[#allocation5 + $0x9e0] sm:$0xff] }
  0xbb   :  { %2066 = vmatpush3.bf16.msra.mxu0 %v2065_v32  ;;  %v2119_v32 = vpack.c.bf16 %v366_v25, %v365_v24  ;;  %v389_v21 = vld [vmem:[#allocation5 + $0x950] sm:$0xff]  ;;  %v375_v24 = vld [vmem:[#allocation5 + $0x8e0] sm:$0xff]  ;;  %v376_v25 = vld [vmem:[#allocation5 + $0x8e8] sm:$0xff] }
  0xbc   :  { %2098 = vmatpush3.bf16.msra.mxu1 %v2097_v33  ;;  %2068 = vmatprep.subr.bf16.mxu0 %v2067_v34  ;;  %v349_v33 = vld [vmem:[#allocation5 + $0x810] sm:$0xff]  ;;  %v350_v34 = vld [vmem:[#allocation5 + $0x818] sm:$0xff]  ;;  %v408_v27 = vld [vmem:[#allocation5 + $0x9e8] sm:$0xff] }
  0xbd   :  { %2100 = vmatprep.subr.bf16.mxu1 %v2099_v38  ;;  %v367_v38 = vld [vmem:[#allocation5 + $0x8a0] sm:$0xff]  ;;  %v2121_v43 = vpack.c.bf16 %v350_v34, %v349_v33  ;;  %v2171_v34 = vpack.c.bf16 %v408_v27, %v407_v26  ;;  %v465_v26 = vld [vmem:[#allocation5 + $0xbb0] sm:$0xff]  ;;  %v466_v27 = vld [vmem:[#allocation5 + $0xbb8] sm:$0xff] }
  0xbe   :  { %v391_v33 = vld [vmem:[#allocation5 + $0x960] sm:$0xff] }
  0xbf   :  { %2070 = vmatpush3.bf16.msra.mxu0 %v2069_v44  ;;  %v86_v44 = vld [vmem:[#allocation2 + $0x98] sm:$0xff] }
  0xc0   :  { %2102 = vmatpush3.bf16.msra.mxu1 %v2101_v45  ;;  %2072 = vmatprep.subr.bf16.mxu0 %v2071_v46  ;;  %v2153_v45 = vpack.c.bf16 %v382_v37, %v381_v35  ;;  %v2123_v46 = vpack.c.bf16 %v368_v39, %v367_v38  ;;  %v392_v35 = vld [vmem:[#allocation5 + $0x968] sm:$0xff]  ;;  %v378_v37 = vld [vmem:[#allocation5 + $0x8f8] sm:$0xff]  ;;  %v409_v38 = vld [vmem:[#allocation5 + $0x9f0] sm:$0xff] }
  0xc1   :  { %2104 = vmatprep.subr.bf16.mxu1 %v2103_v50  ;;  %v2155_v50 = vpack.c.bf16 %v400_v41, %v399_v40  ;;  %v410_v39 = vld [vmem:[#allocation5 + $0x9f8] sm:$0xff]  ;;  %v2173_v41 = vpack.c.bf16 %v392_v35, %v391_v33  ;;  %v449_v33 = vld [vmem:[#allocation5 + $0xb30] sm:$0xff] }
  0xc2   :  { %v450_v35 = vld [vmem:[#allocation5 + $0xb38] sm:$0xff] }
  0xc3   :  { %2074 = vmatpush3.bf16.msra.mxu0 %v2073_v56  ;;  %v2125_v56 = vpack.c.bf16 %v352_v48, %v351_v47  ;;  %v394_v47 = vld [vmem:[#allocation5 + $0x978] sm:$0xff]  ;;  %v427_v48 = vld [vmem:[#allocation5 + $0xa80] sm:$0xff] }
  0xc4   :  { %2106 = vmatpush3.bf16.msra.mxu1 %v2105_v57  ;;  %2076 = vmatprep.subr.bf16.mxu0 %v2075_v58  ;;  %v2157_v57 = vpack.c.bf16 %v384_v51, %v383_v49  ;;  %v2127_v58 = vpack.c.bf16 %v370_v53, %v369_v52  ;;  %v428_v49 = vld [vmem:[#allocation5 + $0xa88] sm:$0xff] }
  0xc5   :  { %2108 = vmatprep.subr.bf16.mxu1 %v2107_v62  ;;  %v2159_v62 = vpack.c.bf16 %v402_v55, %v401_v54  ;;  %v460_v51 = vld [vmem:[#allocation5 + $0xb88] sm:$0xff]  ;;  %v2179_v54 = vpack.c.bf16 %v428_v49, %v427_v48  ;;  %v411_v55 = vld [vmem:[#allocation5 + $0xa00] sm:$0xff]  ;;  %v437_v48 = vld [vmem:[#allocation5 + $0xad0] sm:$0xff] }
  0xc6   :  { %v438_v49 = vld [vmem:[#allocation5 + $0xad8] sm:$0xff] }
  0xc7   :  { %2078 = vmatpush3.bf16.msra.mxu0 %v2077_v4  ;;  %v2129_v4 = vpack.c.bf16 %v354_v60, %v353_v59  ;;  %v444_v59 = vld [vmem:[#allocation5 + $0xb08] sm:$0xff]  ;;  %v429_v60 = vld [vmem:[#allocation5 + $0xa90] sm:$0xff] }
  0xc8   :  { %2110 = vmatpush3.bf16.msra.mxu1 %v2109_v5  ;;  %2080 = vmatprep.subr.bf16.mxu0 %v2079_v6  ;;  %v2161_v5 = vpack.c.bf16 %v386_v63, %v385_v61  ;;  %v2131_v6 = vpack.c.bf16 %v372_v1, %v371_v0  ;;  %v430_v61 = vld [vmem:[#allocation5 + $0xa98] sm:$0xff]  ;;  %v83_v0 = vld [vmem:[#allocation2 + $0x80] sm:$0xff] }
  0xc9   :  { %2112 = vmatprep.subr.bf16.mxu1 %v2111_v10  ;;  %v2163_v10 = vpack.c.bf16 %v404_v3, %v403_v2  ;;  %v462_v63 = vld [vmem:[#allocation5 + $0xb98] sm:$0xff]  ;;  %v85_v2 = vld [vmem:[#allocation2 + $0x90] sm:$0xff] }
  0xcb   :  { %2082 = vmatpush3.bf16.msra.mxu0 %v2081_v16  ;;  %v2133_v16 = vpack.c.bf16 %v356_v8, %v355_v7  ;;  %v445_v7 = vld [vmem:[#allocation5 + $0xb10] sm:$0xff] }
  0xcc   :  { %2114 = vmatpush3.bf16.msra.mxu1 %v2113_v17  ;;  %2116 = vmatprep.subr.bf16.mxu0 %v2115_v18  ;;  %v2165_v17 = vpack.c.bf16 %v388_v11, %v387_v9  ;;  %v2135_v18 = vpack.c.bf16 %v374_v13, %v373_v12  ;;  %v446_v9 = vld [vmem:[#allocation5 + $0xb18] sm:$0xff]  ;;  %v432_v11 = vld [vmem:[#allocation5 + $0xaa8] sm:$0xff]  ;;  %v463_v12 = vld [vmem:[#allocation5 + $0xba0] sm:$0xff] }
  0xcd   :  { %2148 = vmatprep.subr.bf16.mxu1 %v2147_v22  ;;  %v2167_v22 = vpack.c.bf16 %v406_v15, %v405_v14  ;;  %v464_v13 = vld [vmem:[#allocation5 + $0xba8] sm:$0xff] }
  0xce   :  { %960 = vmatmul.mubr.f32.vlgmr.msra.gmra.mrb[6].mxu0 %v79_v28  ;;  %v2137_v28 = vpack.c.bf16 %v358_v20, %v357_v19  ;;  %v88_v14 = vld [vmem:[#allocation2 + $0xa8] sm:$0xff]  ;;  %v415_v19 = vld [vmem:[#allocation5 + $0xa20] sm:$0xff] }
  0xcf   :  { %2118 = vmatpush3.bf16.msra.mxu0 %v2117_v29  ;;  %1030 = vmatmul.mubr.f32.vlgmr.msra.gmra.mrb[6].mxu1 %v81_v30  ;;  %v2169_v29 = vpack.c.bf16 %v390_v23, %v389_v21  ;;  %v2139_v30 = vpack.c.bf16 %v376_v25, %v375_v24  ;;  %v416_v20 = vld [vmem:[#allocation5 + $0xa28] sm:$0xff]  ;;  %v447_v21 = vld [vmem:[#allocation5 + $0xb20] sm:$0xff]  ;;  %v433_v24 = vld [vmem:[#allocation5 + $0xab0] sm:$0xff] }
  0xd0   :  { %2150 = vmatpush3.bf16.msra.mxu1 %v2149_v31  ;;  %2120 = vmatprep.subr.bf16.mxu0 %v2119_v32  ;;  %v359_v31 = vld [vmem:[#allocation5 + $0x860] sm:$0xff]  ;;  %v360_v32 = vld [vmem:[#allocation5 + $0x868] sm:$0xff]  ;;  %v434_v25 = vld [vmem:[#allocation5 + $0xab8] sm:$0xff] }
  0xd1   :  { %2152 = vmatprep.subr.bf16.mxu1 %v2151_v36  ;;  %1099 = vmatprep.mubr.f32.mxu0 %v84_v42  ;;  %v377_v36 = vld [vmem:[#allocation5 + $0x8f0] sm:$0xff]  ;;  %v2141_v40 = vpack.c.bf16 %v360_v32, %v359_v31  ;;  %v448_v23 = vld [vmem:[#allocation5 + $0xb28] sm:$0xff]  ;;  %v418_v32 = vld [vmem:[#allocation5 + $0xa38] sm:$0xff] }
  0xd2   :  { %1169 = vmatprep.mubr.f32.mxu1 %v86_v44  ;;  %v2143_v42 = vpack.c.bf16 %v378_v37, %v377_v36  ;;  %v362_v44 = vld [vmem:[#allocation5 + $0x878] sm:$0xff]  ;;  %v417_v31 = vld [vmem:[#allocation5 + $0xa30] sm:$0xff]  ;;  %v435_v36 = vld [vmem:[#allocation5 + $0xac0] sm:$0xff] }
  0xd3   :  { %2122 = vmatpush3.bf16.msra.mxu0 %v2121_v43  ;;  %v361_v43 = vld [vmem:[#allocation5 + $0x870] sm:$0xff]  ;;  %v436_v37 = vld [vmem:[#allocation5 + $0xac8] sm:$0xff] }
  0xd4   :  { %2154 = vmatpush3.bf16.msra.mxu1 %v2153_v45  ;;  %2124 = vmatprep.subr.bf16.mxu0 %v2123_v46  ;;  %v393_v45 = vld [vmem:[#allocation5 + $0x970] sm:$0xff]  ;;  %v2175_v46 = vpack.c.bf16 %v410_v39, %v409_v38  ;;  %v2145_v52 = vpack.c.bf16 %v362_v44, %v361_v43  ;;  %v467_v38 = vld [vmem:[#allocation5 + $0xbc0] sm:$0xff]  ;;  %v468_v39 = vld [vmem:[#allocation5 + $0xbc8] sm:$0xff] }
  0xd5   :  { %2156 = vmatprep.subr.bf16.mxu1 %v2155_v50  ;;  %v459_v50 = vld [vmem:[#allocation5 + $0xb80] sm:$0xff]  ;;  %v2177_v53 = vpack.c.bf16 %v394_v47, %v393_v45  ;;  %v420_v44 = vld [vmem:[#allocation5 + $0xa48] sm:$0xff] }
  0xd6   :  { %v419_v43 = vld [vmem:[#allocation5 + $0xa40] sm:$0xff]  ;;  %v452_v47 = vld [vmem:[#allocation5 + $0xb48] sm:$0xff] }
  0xd7   :  { %2126 = vmatpush3.bf16.msra.mxu0 %v2125_v56  ;;  %v412_v56 = vld [vmem:[#allocation5 + $0xa08] sm:$0xff]  ;;  %v451_v45 = vld [vmem:[#allocation5 + $0xb40] sm:$0xff] }
  0xd8   :  { %2158 = vmatpush3.bf16.msra.mxu1 %v2157_v57  ;;  %2128 = vmatprep.subr.bf16.mxu0 %v2127_v58  ;;  %v443_v57 = vld [vmem:[#allocation5 + $0xb00] sm:$0xff]  ;;  %v2211_v58 = vpack.c.bf16 %v460_v51, %v459_v50  ;;  %v2181_v1 = vpack.c.bf16 %v412_v56, %v411_v55  ;;  %v469_v50 = vld [vmem:[#allocation5 + $0xbd0] sm:$0xff]  ;;  %v470_v51 = vld [vmem:[#allocation5 + $0xbd8] sm:$0xff] }
  0xd9   :  { %2160 = vmatprep.subr.bf16.mxu1 %v2159_v62  ;;  %v461_v62 = vld [vmem:[#allocation5 + $0xb90] sm:$0xff]  ;;  %v2213_v3 = vpack.c.bf16 %v444_v59, %v443_v57  ;;  %v422_v56 = vld [vmem:[#allocation5 + $0xa58] sm:$0xff] }
  0xda   :  { %v2215_v8 = vpack.c.bf16 %v462_v63, %v461_v62  ;;  %v421_v55 = vld [vmem:[#allocation5 + $0xa50] sm:$0xff]  ;;  %v454_v59 = vld [vmem:[#allocation5 + $0xb58] sm:$0xff]  ;;  %v471_v62 = vld [vmem:[#allocation5 + $0xbe0] sm:$0xff] }
  0xdb   :  { %2130 = vmatpush3.bf16.msra.mxu0 %v2129_v4  ;;  %v2183_v4 = vpack.c.bf16 %v430_v61, %v429_v60  ;;  %v453_v57 = vld [vmem:[#allocation5 + $0xb50] sm:$0xff]  ;;  %v439_v60 = vld [vmem:[#allocation5 + $0xae0] sm:$0xff]  ;;  %v440_v61 = vld [vmem:[#allocation5 + $0xae8] sm:$0xff] }
  0xdc   :  { %2162 = vmatpush3.bf16.msra.mxu1 %v2161_v5  ;;  %2132 = vmatprep.subr.bf16.mxu0 %v2131_v6  ;;  %v413_v5 = vld [vmem:[#allocation5 + $0xa10] sm:$0xff]  ;;  %v414_v6 = vld [vmem:[#allocation5 + $0xa18] sm:$0xff]  ;;  %v472_v63 = vld [vmem:[#allocation5 + $0xbe8] sm:$0xff] }
  0xdd   :  { %2164 = vmatprep.subr.bf16.mxu1 %v2163_v10  ;;  %v431_v10 = vld [vmem:[#allocation5 + $0xaa0] sm:$0xff]  ;;  %v2185_v15 = vpack.c.bf16 %v414_v6, %v413_v5  ;;  %v2235_v6 = vpack.c.bf16 %v472_v63, %v471_v62 }
  0xde   :  { %v455_v5 = vld [vmem:[#allocation5 + $0xb60] sm:$0xff] }
  0xdf   :  { %2134 = vmatpush3.bf16.msra.mxu0 %v2133_v16  ;;  %v90_v16 = vld [vmem:[#allocation2 + $0xb8] sm:$0xff] }
  0xe0   :  { %2166 = vmatpush3.bf16.msra.mxu1 %v2165_v17  ;;  %2136 = vmatprep.subr.bf16.mxu0 %v2135_v18  ;;  %v2217_v17 = vpack.c.bf16 %v446_v9, %v445_v7  ;;  %v2187_v18 = vpack.c.bf16 %v432_v11, %v431_v10  ;;  %v456_v7 = vld [vmem:[#allocation5 + $0xb68] sm:$0xff]  ;;  %v442_v9 = vld [vmem:[#allocation5 + $0xaf8] sm:$0xff]  ;;  %v473_v10 = vld [vmem:[#allocation5 + $0xbf0] sm:$0xff] }
  0xe1   :  { %2168 = vmatprep.subr.bf16.mxu1 %v2167_v22  ;;  %v2219_v22 = vpack.c.bf16 %v464_v13, %v463_v12  ;;  %v474_v11 = vld [vmem:[#allocation5 + $0xbf8] sm:$0xff]  ;;  %v2237_v13 = vpack.c.bf16 %v456_v7, %v455_v5 }
  0xe3   :  { %2138 = vmatpush3.bf16.msra.mxu0 %v2137_v28  ;;  %v2189_v28 = vpack.c.bf16 %v416_v20, %v415_v19  ;;  %v458_v19 = vld [vmem:[#allocation5 + $0xb78] sm:$0xff] }
  0xe4   :  { %2170 = vmatpush3.bf16.msra.mxu1 %v2169_v29  ;;  %2140 = vmatprep.subr.bf16.mxu0 %v2139_v30  ;;  %v2221_v29 = vpack.c.bf16 %v448_v23, %v447_v21  ;;  %v2191_v30 = vpack.c.bf16 %v434_v25, %v433_v24  ;;  %v89_v23 = vld [vmem:[#allocation2 + $0xb0] sm:$0xff] }
  0xe5   :  { %2172 = vmatprep.subr.bf16.mxu1 %v2171_v34  ;;  %v2223_v34 = vpack.c.bf16 %v466_v27, %v465_v26 }
  0xe7   :  { %2142 = vmatpush3.bf16.msra.mxu0 %v2141_v40  ;;  %v2193_v40 = vpack.c.bf16 %v418_v32, %v417_v31 }
  0xe8   :  { %2174 = vmatpush3.bf16.msra.mxu1 %v2173_v41  ;;  %2144 = vmatprep.subr.bf16.mxu0 %v2143_v42  ;;  %v2225_v41 = vpack.c.bf16 %v450_v35, %v449_v33  ;;  %v2195_v42 = vpack.c.bf16 %v436_v37, %v435_v36 }
  0xe9   :  { %2176 = vmatprep.subr.bf16.mxu1 %v2175_v46  ;;  %v2227_v46 = vpack.c.bf16 %v468_v39, %v467_v38  ;;  %v1316_v39 = vld [vmem:[#allocation7] sm:$0xf] }
  0xeb   :  { %2146 = vmatpush3.bf16.msra.mxu0 %v2145_v52  ;;  %v2197_v52 = vpack.c.bf16 %v420_v44, %v419_v43 }
  0xec   :  { %2178 = vmatpush3.bf16.msra.mxu1 %v2177_v53  ;;  %2180 = vmatprep.subr.bf16.mxu0 %v2179_v54  ;;  %v2229_v53 = vpack.c.bf16 %v452_v47, %v451_v45  ;;  %v2199_v54 = vpack.c.bf16 %v438_v49, %v437_v48 }
  0xed   :  { %2212 = vmatprep.subr.bf16.mxu1 %v2211_v58  ;;  %v2231_v58 = vpack.c.bf16 %v470_v51, %v469_v50 }
  0xee   :  { %1100 = vmatmul.mubr.f32.vlgmr.msra.gmra.mrb[8].mxu0 %v83_v0  ;;  %v2201_v0 = vpack.c.bf16 %v422_v56, %v421_v55 }
  0xef   :  { %2182 = vmatpush3.bf16.msra.mxu0 %v2181_v1  ;;  %1170 = vmatmul.mubr.f32.vlgmr.msra.gmra.mrb[8].mxu1 %v85_v2  ;;  %v2233_v1 = vpack.c.bf16 %v454_v59, %v453_v57  ;;  %v2203_v2 = vpack.c.bf16 %v440_v61, %v439_v60 }
  0xf0   :  { %2214 = vmatpush3.bf16.msra.mxu1 %v2213_v3  ;;  %2184 = vmatprep.subr.bf16.mxu0 %v2183_v4  ;;  %v423_v3 = vld [vmem:[#allocation5 + $0xa60] sm:$0xff]  ;;  %v424_v4 = vld [vmem:[#allocation5 + $0xa68] sm:$0xff] }
  0xf1   :  { %2216 = vmatprep.subr.bf16.mxu1 %v2215_v8  ;;  %1239 = vmatprep.mubr.f32.mxu0 %v88_v14  ;;  %v441_v8 = vld [vmem:[#allocation5 + $0xaf0] sm:$0xff]  ;;  %v2205_v12 = vpack.c.bf16 %v424_v4, %v423_v3 }
  0xf2   :  { %1309 = vmatprep.mubr.f32.mxu1 %v90_v16  ;;  %v2207_v14 = vpack.c.bf16 %v442_v9, %v441_v8  ;;  %v426_v16 = vld [vmem:[#allocation5 + $0xa78] sm:$0xff] }
  0xf3   :  { %2186 = vmatpush3.bf16.msra.mxu0 %v2185_v15  ;;  %v425_v15 = vld [vmem:[#allocation5 + $0xa70] sm:$0xff] }
  0xf4   :  { %2218 = vmatpush3.bf16.msra.mxu1 %v2217_v17  ;;  %2188 = vmatprep.subr.bf16.mxu0 %v2187_v18  ;;  %v2239_v17 = vpack.c.bf16 %v474_v11, %v473_v10  ;;  %v457_v18 = vld [vmem:[#allocation5 + $0xb70] sm:$0xff]  ;;  %v2209_v20 = vpack.c.bf16 %v426_v16, %v425_v15  ;;  %v1428_v10 = vld [vmem:[#allocation8] ss:$0 sm:$0xff] }
  0xf5   :  { %2220 = vmatprep.subr.bf16.mxu1 %v2219_v22  ;;  %v2241_v21 = vpack.c.bf16 %v458_v19, %v457_v18  ;;  %v87_v22 = vld [vmem:[#allocation2 + $0xa0] sm:$0xff] }
  0xf7   :  { %2190 = vmatpush3.bf16.msra.mxu0 %v2189_v28 }
  0xf8   :  { %2222 = vmatpush3.bf16.msra.mxu1 %v2221_v29  ;;  %2192 = vmatprep.subr.bf16.mxu0 %v2191_v30 }
  0xf9   :  { %2224 = vmatprep.subr.bf16.mxu1 %v2223_v34 }
  0xfb   :  { %2194 = vmatpush3.bf16.msra.mxu0 %v2193_v40  ;;  %v2380_v40 = vmov 0.0  }
  0xfc   :  { %2226 = vmatpush3.bf16.msra.mxu1 %v2225_v41  ;;  %2196 = vmatprep.subr.bf16.mxu0 %v2195_v42 }
  0xfd   :  { %2228 = vmatprep.subr.bf16.mxu1 %v2227_v46 }
  0xff   :  { %2198 = vmatpush3.bf16.msra.mxu0 %v2197_v52 }
 0x100   :  { %2230 = vmatpush3.bf16.msra.mxu1 %v2229_v53  ;;  %2200 = vmatprep.subr.bf16.mxu0 %v2199_v54 }
 0x101   :  { %2232 = vmatprep.subr.bf16.mxu1 %v2231_v58 }
 0x103   :  { %2202 = vmatpush3.bf16.msra.mxu0 %v2201_v0 }
 0x104   :  { %2234 = vmatpush3.bf16.msra.mxu1 %v2233_v1  ;;  %2204 = vmatprep.subr.bf16.mxu0 %v2203_v2 }
 0x105   :  { %2236 = vmatprep.subr.bf16.mxu1 %v2235_v6 }
 0x107   :  { %2206 = vmatpush3.bf16.msra.mxu0 %v2205_v12 }
 0x108   :  { %2238 = vmatpush3.bf16.msra.mxu1 %v2237_v13  ;;  %2208 = vmatprep.subr.bf16.mxu0 %v2207_v14 }
 0x109   :  { %2240 = vmatprep.subr.bf16.mxu1 %v2239_v17 }
 0x10b   :  { %2210 = vmatpush3.bf16.msra.mxu0 %v2209_v20 }
 0x10c   :  { %2242 = vmatpush3.bf16.msra.mxu1 %v2241_v21  ;;  %1854 = vmatprep.subr.mxu0 %v2380_v40 }
 0x10e   :  { %1240 = vmatmul.mubr.f32.vlgmr.msra.gmra.mrb[10].mxu0 %v87_v22 }
 0x10f   :  { %1310 = vmatmul.mubr.f32.vlgmr.msra.gmra.mrb[10].mxu1 %v89_v23  ;;  %1856 = vmatprep.mubr.msk.f32.mxu0 %vm2381_vm1, %v2380_v40 }
 0x110   :  { %1855 = vmatpush3.msk.msra.mxu0 %vm1328_vm0, %v1316_v39 }
 0x141   :  { %v1464_v24 = vpop.f32.mrb[0].mxu0 }
 0x142   :  { %v1499_v25 = vpop.f32.mrb[0].mxu1  ;;  %v1465_v26 = vpop.f32.mrb[1].mxu0 }
 0x143   :  { %v1466_v27 = vadd.f32 %v1465_v26, %v1464_v24  ;;  %v1500_v28 = vpop.f32.mrb[1].mxu1 }
 0x144   :  { %v1501_v29 = vadd.f32 %v1500_v28, %v1499_v25 }
 0x146   :  { %v612_v30 = vadd.f32 %v1501_v29, %v1466_v27 }
 0x161   :  { %v1534_v31 = vpop.f32.mrb[2].mxu0 }
 0x162   :  { %v1535_v32 = vpop.f32.mrb[3].mxu0  ;;  %v1569_v33 = vpop.f32.mrb[2].mxu1 }
 0x163   :  { %v1536_v34 = vadd.f32 %v1535_v32, %v1534_v31  ;;  %v1570_v35 = vpop.f32.mrb[3].mxu1 }
 0x164   :  { %v1571_v36 = vadd.f32 %v1570_v35, %v1569_v33 }
 0x165   :  { %v682_v37 = vadd.f32 %v1536_v34, %v612_v30 }
 0x167   :  { %v752_v38 = vadd.f32 %v1571_v36, %v682_v37 }
 0x181   :  { %v1604_v41 = vpop.f32.mrb[4].mxu0 }
 0x182   :  { %v1605_v42 = vpop.f32.mrb[5].mxu0  ;;  %v1639_v43 = vpop.f32.mrb[4].mxu1 }
 0x183   :  { %v1606_v44 = vadd.f32 %v1605_v42, %v1604_v41  ;;  %v1640_v45 = vpop.f32.mrb[5].mxu1 }
 0x184   :  { %v1641_v46 = vadd.f32 %v1640_v45, %v1639_v43 }
 0x185   :  { %v822_v47 = vadd.f32 %v1606_v44, %v752_v38 }
 0x187   :  { %v892_v48 = vadd.f32 %v1641_v46, %v822_v47 }
 0x1a1   :  { %v1674_v49 = vpop.f32.mrb[6].mxu0 }
 0x1a2   :  { %v1675_v50 = vpop.f32.mrb[7].mxu0  ;;  %v1709_v51 = vpop.f32.mrb[6].mxu1 }
 0x1a3   :  { %v1676_v52 = vadd.f32 %v1675_v50, %v1674_v49  ;;  %v1710_v53 = vpop.f32.mrb[7].mxu1 }
 0x1a4   :  { %v1711_v54 = vadd.f32 %v1710_v53, %v1709_v51 }
 0x1a5   :  { %v962_v55 = vadd.f32 %v1676_v52, %v892_v48 }
 0x1a7   :  { %v1032_v56 = vadd.f32 %v1711_v54, %v962_v55 }
 0x1c1   :  { %v1744_v57 = vpop.f32.mrb[8].mxu0 }
 0x1c2   :  { %v1745_v58 = vpop.f32.mrb[9].mxu0  ;;  %v1779_v59 = vpop.f32.mrb[8].mxu1 }
 0x1c3   :  { %v1746_v60 = vadd.f32 %v1745_v58, %v1744_v57  ;;  %v1780_v61 = vpop.f32.mrb[9].mxu1 }
 0x1c4   :  { %v1781_v62 = vadd.f32 %v1780_v61, %v1779_v59 }
 0x1c5   :  { %v1102_v63 = vadd.f32 %v1746_v60, %v1032_v56 }
 0x1c7   :  { %v1172_v0 = vadd.f32 %v1781_v62, %v1102_v63 }
 0x1e1   :  { %v1814_v1 = vpop.f32.mrb[10].mxu0 }
 0x1e2   :  { %v1815_v2 = vpop.f32.mrb[11].mxu0  ;;  %v1849_v3 = vpop.f32.mrb[10].mxu1 }
 0x1e3   :  { %v1816_v4 = vadd.f32 %v1815_v2, %v1814_v1  ;;  %v1850_v5 = vpop.f32.mrb[11].mxu1 }
 0x1e4   :  { %v1851_v6 = vadd.f32 %v1850_v5, %v1849_v3 }
 0x1e5   :  { %v1242_v7 = vadd.f32 %v1816_v4, %v1172_v0 }
 0x1e7   :  { %v1312_v8 = vadd.f32 %v1851_v6, %v1242_v7 }
 0x1e9   :  { %v1315_v9 = vmax.f32 %v1312_v8, 0.0 }
 0x1eb   :  { %1857 = vmatmul.mubr.msk.f32.vlgmr.msra.gmra.mrb[12].mxu0 %vm1324_vm2, %v1315_v9 }
 0x2be   :  { %v1398_v11 = vpop.f32.mrb[12].mxu0 }
 0x2bf   :  { %v1399_v12 = vadd.f32 %v1428_v10, %v1398_v11  ;;  %v1858_v13 = vpop.f32.mrb[13].mxu0 }
 0x2c1   :  { %v1431_v14 = vmul.f32 -1.442695, %v1399_v12 }
 0x2c3   :  { %2252 = vpow2.f32 %v1431_v14 }
 0x2cd   :  { %v2253_v15 = vpop.eup %2252 }
 0x2ce   :  { %v1405_v16 = vadd.f32 1.0, %v2253_v15 }
 0x2d0   :  { %2254 = vrcp.f32 %v1405_v16 }
 0x2da   :  { %v2255_v17 = vpop.eup %2254 }
 0x2db   :  { %v1408_v18 = vadd.f32 1.0, %v2255_v17 }
 0x2dd   :  { %1410 = vst.msk [vmem:[#allocation10] sm:$0xff] %vm1409_vm3, %v1408_v18 }
 0x2de   :  { %2355 = shalt.err (!%p2352_p8)
}
 0x2df   :  { %s2356_s14 = scalar_lea.hbm %s2472_s4, 128 }
 0x2e0   :  { %p2357_p9 = scmp.ne.s32.totalorder %s2472_s4, %s2356_s14  ;;  %p2360_p10 = scmp.lt.u32.totalorder %s2356_s14, %s2472_s4 }
 0x2e2   :  { %p2362_p11 = pnand %p2360_p10, %p2357_p9 }
 0x2e4   :  { %2365 = shalt.err (!%p2362_p11)
}
 0x2e5   :  { %1420 = dma.vmem_to_hbm [thread:$0]  %s1418_s11, 128, %s2472_s4, [#allocation4]  }
 0x2e6   :  { %2372 = dma.done.wait [#allocation4], 128  }
 0x2e7   :  { %2373 = vsyncadd [#allocation4], 4294967168 }
 0x2e8   :  { %1424 = vsyncpa [#allocation3], 1 }
 0x2e9   :  { %1425 = vsyncpa [#allocation6], 1 }
 0x2ea   :  { %1426 = vsyncpa [#allocation9], 1 }
 0x2eb   :  { %1427 = vsyncpa [#allocation4], 1 }

</bundles_post_ra>
